<compile_context>
chip_gen: v6e
topology: v6e:2x2x1
jax: 0.10.0
libtpu: 0.0.40
codegen_flags: <defaults>
</compile_context>

<pallas_src>
import functools
import math

import jax
import jax.numpy as jnp
from jax.experimental import pallas as pl
from jax.experimental.pallas import tpu as pltpu


# ----------------------------------------------------------------------------
# Pallas kernel: one GATConv layer (all heads), dense adjacency, online softmax
# over source tiles.
#   er_ref  : (T, H)        destination attention term for this dst tile
#   elT_ref : (H, TK)       source attention term for this src tile (pre-T)
#   z_ref   : (H, TK, F+1)  transformed source features + ones column
#   adj_ref : (T, TK)       int8 0/1 incoming-edge mask block
#   out_ref : (T, H*F)
#   m_sc    : (H, T, 1)     running row max          (f32 scratch)
#   acc_sc  : (H, T, F+1)   running unnormalised acc (f32 scratch); col F = denom
# ----------------------------------------------------------------------------
def _gatconv_kernel(er_ref, elT_ref, z_ref, adj_ref, out_ref, m_sc, acc_sc, *,
                    num_heads, out_feats, negative_slope, apply_elu):
    f32 = jnp.float32
    k = pl.program_id(1)
    nk = pl.num_programs(1)

    @pl.when(k == 0)
    def _():
        m_sc[...] = jnp.full(m_sc.shape, -jnp.inf, f32)
        acc_sc[...] = jnp.zeros(acc_sc.shape, f32)

    adj = adj_ref[...].astype(f32)                      # (T, TK) 0/1 mask
    er = er_ref[...]                                    # (T, H)
    elT = elT_ref[...]                                  # (H, TK)

    for h in range(num_heads):                          # static, small unroll
        e = er[:, h:h + 1] + elT[h:h + 1, :]            # (T, TK)
        e = jnp.where(e > 0, e, negative_slope * e)     # LeakyReLU (f32, VALU)

        m_prev = m_sc[h]                                # (T, 1)
        m_new = jnp.maximum(m_prev, jnp.max(e, axis=-1, keepdims=True))
        # mask AFTER the exp: exp(e - m_new) <= 1 everywhere, non-edges zeroed
        p = jnp.exp(e - m_new) * adj                    # (T, TK)
        alpha = jnp.exp(m_prev - m_new)                 # (T, 1) rescale old acc

        # aggregation matmul; the ones column of z carries the denominator
        acc_sc[h] = alpha * acc_sc[h] + jnp.dot(
            p, z_ref[h], preferred_element_type=f32)    # (T, F+1)
        m_sc[h] = m_new

    @pl.when(k == nk - 1)
    def _():
        outs = []
        for h in range(num_heads):
            a = acc_sc[h]                               # (T, F+1)
            denom = a[:, out_feats:out_feats + 1]       # (T, 1)
            rst = a[:, :out_feats] / denom              # normalise after agg
            if apply_elu:
                rst = jnp.where(rst > 0, rst,
                                jnp.exp(jnp.minimum(rst, 0.0)) - 1.0)
            outs.append(rst)
        # single lane-dense store of all heads
        out_ref[...] = jnp.concatenate(outs, axis=-1).astype(out_ref.dtype)


# ----------------------------------------------------------------------------
# helpers
# ----------------------------------------------------------------------------
def _round_up(x, m):
    return ((x + m - 1) // m) * m


def _pad_axis(a, axis, new_size):
    pad = new_size - a.shape[axis]
    if pad <= 0:
        return a
    widths = [(0, 0)] * a.ndim
    widths[axis] = (0, pad)
    return jnp.pad(a, widths)


def _vmem_bytes_estimate(T, TK, H, F):
    dbl = 2  # double-buffered pipeline blocks
    adj_b = T * TK * 1 * dbl
    er_b = T * H * 4 * dbl
    elT_b = H * TK * 4 * dbl
    z_b = H * TK * (F + 1) * 4 * dbl
    out_b = T * H * F * 4 * dbl
    scratch = H * T * 4 + H * T * (F + 1) * 4
    temps = 6 * T * TK * 4  # e / p / where intermediates (one head live at a time)
    return adj_b + er_b + elT_b + z_b + out_b + scratch + temps


# ----------------------------------------------------------------------------
# GATConv wrapper: hoisted matmuls + pallas_call.
# ----------------------------------------------------------------------------
def gat_conv(params, adj, x, *, negative_slope=0.2, apply_elu=True):
    W, attn_l, attn_r = params["W"], params["attn_l"], params["attn_r"]
    din, hf = W.shape
    H, F = attn_l.shape
    assert hf == H * F
    N = x.shape[0]
    f32 = jnp.float32
    x = x.astype(f32)

    # --- hoisted, grid-invariant matmuls (done ONCE per layer, plain XLA) ----
    W3 = W.reshape(din, H, F).astype(f32)
    # fold the per-head attention vectors through W:  el = (x W_h).a_l = x.(W_h a_l)
    vl = jnp.einsum("dhf,hf->dh", W3, attn_l.astype(f32))      # (Din, H)
    vr = jnp.einsum("dhf,hf->dh", W3, attn_r.astype(f32))      # (Din, H)
    z = jnp.einsum("nd,dhf->hnf", x, W3)                        # (H, N, F) head-major
    z_aug = jnp.concatenate([z, jnp.ones((H, N, 1), f32)], -1)  # (H, N, F+1)
    elT = (x @ vl).T                                            # (H, N)  source term
    er = x @ vr                                                 # (N, H)  dest   term

    # --- tiling & padding -----------------------------------------------------
    T = min(128, _round_up(N, 8))          # destination-row tile
    Np = _round_up(N, T)
    if N > 512:
        TK = 512                           # source tile (multiple of 128)
        Nsp = _round_up(N, TK)
    else:
        TK = N                             # single full-width source block
        Nsp = N

    adj_i8 = _pad_axis(_pad_axis(adj.astype(jnp.int8), 0, Np), 1, Nsp)
    er_p = _pad_axis(er, 0, Np)
    elT_p = _pad_axis(elT, 1, Nsp)
    z_p = _pad_axis(z_aug, 1, Nsp)

    grid = (Np // T, Nsp // TK)
    est = _vmem_bytes_estimate(T, TK, H, F)
    vmem_limit = int(min(max(2 * est, 32 << 20), 64 << 20))

    kern = functools.partial(
        _gatconv_kernel,
        num_heads=H,
        out_feats=F,
        negative_slope=float(negative_slope),
        apply_elu=bool(apply_elu),
    )
    out = pl.pallas_call(
        kern,
        out_shape=jax.ShapeDtypeStruct((Np, H * F), f32),
        grid=grid,
        in_specs=[
            pl.BlockSpec((T, H), lambda i, k: (i, 0)),            # er (dst tile)
            pl.BlockSpec((H, TK), lambda i, k: (0, k)),           # elT (src tile)
            pl.BlockSpec((H, TK, F + 1), lambda i, k: (0, k, 0)),  # z (src tile)
            pl.BlockSpec((T, TK), lambda i, k: (i, k)),           # adj block (int8)
        ],
        out_specs=pl.BlockSpec((T, H * F), lambda i, k: (i, 0)),
        scratch_shapes=[
            pltpu.VMEM((H, T, 1), f32),        # running max
            pltpu.VMEM((H, T, F + 1), f32),    # running unnormalised acc (+denom)
        ],
        compiler_params=pltpu.CompilerParams(
            dimension_semantics=("parallel", "arbitrary"),
            vmem_limit_bytes=vmem_limit),
    )(er_p, elT_p, z_p, adj_i8)
    # (N, H*F) == DGL GATConv output (N, H, F) followed by .flatten(1)
    return out[:N]


# ----------------------------------------------------------------------------
# Deterministic parameter init (xavier-normal-like, as in DGL GATConv).
# ----------------------------------------------------------------------------
def init_gatconv(key, in_dim, out_dim, num_heads):
    k1, k2, k3 = jax.random.split(key, 3)
    gain = math.sqrt(2.0)
    std_w = gain * math.sqrt(2.0 / (in_dim + num_heads * out_dim))
    std_a = gain * math.sqrt(2.0 / (1 + out_dim))
    return {
        "W": std_w * jax.random.normal(k1, (in_dim, num_heads * out_dim), jnp.float32),
        "attn_l": std_a * jax.random.normal(k2, (num_heads, out_dim), jnp.float32),
        "attn_r": std_a * jax.random.normal(k3, (num_heads, out_dim), jnp.float32),
    }
    # TODO(synk): bias / residual terms of some DGL GATConv versions omitted
    # (residual=False and zero dropout in this configuration).


def init_gat(key, num_layers, in_dim, hidden_dim, num_classes, heads):
    keys = jax.random.split(key, num_layers + 1)
    layers = [init_gatconv(keys[0], in_dim, hidden_dim, heads[0])]
    for l in range(1, num_layers):
        layers.append(init_gatconv(keys[l], hidden_dim * heads[l - 1], hidden_dim, heads[l]))
    layers.append(init_gatconv(keys[num_layers], hidden_dim * heads[-2], num_classes, heads[-1]))
    return {
        "layers": layers,
        "num_layers": num_layers,
        "heads": list(heads),
        "num_classes": num_classes,
    }


def gat_forward(gat, adj, x):
    h = x
    middle_feats = []
    for l in range(gat["num_layers"]):
        h = gat_conv(gat["layers"][l], adj, h, apply_elu=True)   # already flattened
        middle_feats.append(h)
    H_last = gat["heads"][-1]
    C = gat["num_classes"]
    out = gat_conv(gat["layers"][-1], adj, h, apply_elu=False)   # (N, H_last*C)
    logits = out.reshape(-1, H_last, C).mean(axis=1)             # .mean(1) over heads
    return logits, middle_feats


def init_gat_dif(key, num_layers, in_dim, hidden_dim1, hidden_dim2,
                 num_classes, num_branches, heads):
    heads = list(heads)   # mutated by pop(), like the PyTorch module
    branches = []
    keys = jax.random.split(key, 2 * num_branches)
    for i in range(num_branches):
        if i % 2 == 0:
            branches.append(
                ("base",
                 init_gat(keys[2 * i], num_layers, in_dim, hidden_dim1, num_classes, heads)))
        else:
            heads.pop()
            enc = init_gat(keys[2 * i], num_layers - 1, in_dim, hidden_dim2, hidden_dim1, heads)
            out_conv = init_gatconv(keys[2 * i + 1], hidden_dim1 * heads[-1], num_classes, 1)
            branches.append(("enc", enc, out_conv))
    return branches


def gat_dif_forward(branches, adj, x):
    output = []
    featss = []
    for spec in branches:
        if spec[0] == "base":
            y, feats = gat_forward(spec[1], adj, x)
            output.append(y[None, ...])                          # unsqueeze(0)
            featss.append(feats)
        else:
            # TODO(synk): the reference forward does getattr(self, 'gat_base_'+str(i))
            # for odd branches, which was never created (AttributeError in PyTorch);
            # we follow the apparent intent and use gat_enc_<i>.
            emb, feats = gat_forward(spec[1], adj, x)
            feats = feats + [emb]
            y = gat_conv(spec[2], adj, emb, apply_elu=True)      # (N, 1*C) == squeeze(1)
            output.append(y[None, ...])                          # unsqueeze(0)
            featss.append(feats)
    # (the reference also print()s every middle-feature shape here; omitted)
    return jnp.concatenate(output, axis=0), featss


if __name__ == "__main__":
    key = jax.random.PRNGKey(0)
    N = 32                 # number of graph nodes
    num_layers = 3
    in_dim = 16
    hidden_dim1 = 8
    hidden_dim2 = 8
    num_classes = 4
    num_branches = 2
    heads = [4, 4, 1, 1]

    k_adj, k_x, k_par = jax.random.split(key, 3)
    adj = (jax.random.uniform(k_adj, (N, N)) < 0.15).astype(jnp.float32)
    adj = jnp.maximum(adj, jnp.eye(N, dtype=jnp.float32))   # add self-loops
    x = jax.random.normal(k_x, (N, in_dim), jnp.float32)

    branches = init_gat_dif(k_par, num_layers, in_dim, hidden_dim1, hidden_dim2,
                            num_classes, num_branches, heads)

    out, featss = gat_dif_forward(branches, adj, x)
    jax.block_until_ready(out)
    for feats in featss:
        for f in feats:
            jax.block_until_ready(f)

    assert out.shape == (num_branches, N, num_classes)
    assert [f.shape for f in featss[0]] == [(N, 32), (N, 32), (N, 8)]
    assert [f.shape for f in featss[1]] == [(N, 32), (N, 32), (N, 8)]
    assert bool(jnp.all(jnp.isfinite(out)))
    print("KERNEL_OK")
</pallas_src>

<mosaic_0001>
module attributes {stable_mosaic.version = 11 : i64} {
  func.func @_gatconv_kernel(%arg0: i32, %arg1: i32, %arg2: memref<32x4xf32, #tpu.memory_space<vmem>>, %arg3: memref<4x32xf32, #tpu.memory_space<vmem>>, %arg4: memref<4x32x9xf32, #tpu.memory_space<vmem>>, %arg5: memref<32x32xi8, #tpu.memory_space<vmem>>, %arg6: memref<32x32xf32, #tpu.memory_space<vmem>>, %arg7: memref<4x32x1xf32, #tpu.memory_space<vmem>>, %arg8: memref<4x32x9xf32, #tpu.memory_space<vmem>>) attributes {dimension_semantics = [#tpu.dimension_semantics<parallel>, #tpu.dimension_semantics<arbitrary>], iteration_bounds = array<i64: 1, 1>, scalar_prefetch = 0 : i64, scratch_operands = 2 : i64, tpu.core_type = #tpu.core_type<tc>, window_params = [{transform_indices = @transform_0, window_bounds = array<i64: 32, 4>}, {transform_indices = @transform_1, window_bounds = array<i64: 4, 32>}, {transform_indices = @transform_2, window_bounds = array<i64: 4, 32, 9>}, {transform_indices = @transform_3, window_bounds = array<i64: 32, 32>}, {transform_indices = @transform_4, window_bounds = array<i64: 32, 32>}]} {
    %c0_i32 = arith.constant 0 : i32
    %0 = arith.cmpi eq, %arg1, %c0_i32 : i32
    %1 = arith.extui %0 : i1 to i32
    %c0_i32_0 = arith.constant 0 : i32
    %2 = arith.cmpi ne, %1, %c0_i32_0 : i32
    scf.if %2 {
      %cst_80 = arith.constant 0xFF800000 : f32
      %150 = vector.broadcast %cst_80 : f32 to vector<4x32x1xf32>
      %c0_81 = arith.constant 0 : index
      %c0_82 = arith.constant 0 : index
      %c0_83 = arith.constant 0 : index
      %151 = vector.load %arg7[%c0_81, %c0_82, %c0_83] : memref<4x32x1xf32, #tpu.memory_space<vmem>>, vector<4x32x1xf32>
      tpu.vector_store %arg7[%c0_81, %c0_82, %c0_83], %150 {strides = array<i32>} : memref<4x32x1xf32, #tpu.memory_space<vmem>>, vector<4x32x1xf32>,
      %cst_84 = arith.constant 0.000000e+00 : f32
      %152 = vector.broadcast %cst_84 : f32 to vector<4x32x9xf32>
      %c0_85 = arith.constant 0 : index
      %c0_86 = arith.constant 0 : index
      %c0_87 = arith.constant 0 : index
      %153 = vector.load %arg8[%c0_85, %c0_86, %c0_87] : memref<4x32x9xf32, #tpu.memory_space<vmem>>, vector<4x32x9xf32>
      tpu.vector_store %arg8[%c0_85, %c0_86, %c0_87], %152 {strides = array<i32>} : memref<4x32x9xf32, #tpu.memory_space<vmem>>, vector<4x32x9xf32>,
    } else {
    }
    %c0 = arith.constant 0 : index
    %c0_1 = arith.constant 0 : index
    %3 = vector.load %arg5[%c0, %c0_1] : memref<32x32xi8, #tpu.memory_space<vmem>>, vector<32x32xi8>
    %4 = arith.sitofp %3 : vector<32x32xi8> to vector<32x32xf32>
    %c0_2 = arith.constant 0 : index
    %c0_3 = arith.constant 0 : index
    %5 = vector.load %arg2[%c0_2, %c0_3] : memref<32x4xf32, #tpu.memory_space<vmem>>, vector<32x4xf32>
    %c0_4 = arith.constant 0 : index
    %c0_5 = arith.constant 0 : index
    %6 = vector.load %arg3[%c0_4, %c0_5] : memref<4x32xf32, #tpu.memory_space<vmem>>, vector<4x32xf32>
    %7 = vector.extract_strided_slice %5 {offsets = [0, 0], sizes = [32, 1], strides = [1, 1]} : vector<32x4xf32> to vector<32x1xf32>
    %8 = vector.extract_strided_slice %6 {offsets = [0, 0], sizes = [1, 32], strides = [1, 1]} : vector<4x32xf32> to vector<1x32xf32>
    %9 = vector.broadcast %7 : vector<32x1xf32> to vector<32x32xf32>
    %10 = vector.broadcast %8 : vector<1x32xf32> to vector<32x32xf32>
    %11 = arith.addf %9, %10 : vector<32x32xf32>
    %cst = arith.constant 0.000000e+00 : f32
    %12 = vector.broadcast %cst : f32 to vector<32x32xf32>
    %13 = arith.cmpf ogt, %11, %12 : vector<32x32xf32>
    %cst_6 = arith.constant 2.000000e-01 : f32
    %14 = vector.broadcast %cst_6 : f32 to vector<32x32xf32>
    %15 = arith.mulf %14, %11 : vector<32x32xf32>
    %16 = arith.select %13, %11, %15 : vector<32x32xi1>, vector<32x32xf32>
    %c0_7 = arith.constant 0 : index
    %c0_8 = arith.constant 0 : index
    %c0_9 = arith.constant 0 : index
    %17 = vector.load %arg7[%c0_7, %c0_8, %c0_9] : memref<4x32x1xf32, #tpu.memory_space<vmem>>, vector<1x32x1xf32>
    %18 = vector.shape_cast %17 : vector<1x32x1xf32> to vector<32x1xf32>
    %cst_10 = arith.constant dense<0xFF800000> : vector<32xf32>
    %19 = vector.multi_reduction <maximumf>, %16, %cst_10 [1] : vector<32x32xf32> to vector<32xf32>
    %20 = vector.shape_cast %19 : vector<32xf32> to vector<32x1xf32>
    %21 = arith.maximumf %18, %20 : vector<32x1xf32>
    %22 = vector.broadcast %21 : vector<32x1xf32> to vector<32x32xf32>
    %23 = arith.subf %16, %22 : vector<32x32xf32>
    %24 = math.exp %23 : vector<32x32xf32>
    %25 = arith.mulf %24, %4 : vector<32x32xf32>
    %26 = arith.subf %18, %21 : vector<32x1xf32>
    %27 = math.exp %26 : vector<32x1xf32>
    %c0_11 = arith.constant 0 : index
    %c0_12 = arith.constant 0 : index
    %c0_13 = arith.constant 0 : index
    %28 = vector.load %arg8[%c0_11, %c0_12, %c0_13] : memref<4x32x9xf32, #tpu.memory_space<vmem>>, vector<1x32x9xf32>
    %29 = vector.shape_cast %28 : vector<1x32x9xf32> to vector<32x9xf32>
    %30 = vector.broadcast %27 : vector<32x1xf32> to vector<32x9xf32>
    %31 = arith.mulf %30, %29 : vector<32x9xf32>
    %c0_14 = arith.constant 0 : index
    %c0_15 = arith.constant 0 : index
    %c0_16 = arith.constant 0 : index
    %32 = vector.load %arg4[%c0_14, %c0_15, %c0_16] : memref<4x32x9xf32, #tpu.memory_space<vmem>>, vector<1x32x9xf32>
    %33 = vector.shape_cast %32 : vector<1x32x9xf32> to vector<32x9xf32>
    %cst_17 = arith.constant dense<0.000000e+00> : vector<32x9xf32>
    %34 = tpu.matmul %25, %33, %cst_17 {dimension_numbers = #tpu.dot_dimension_numbers<[1], [0], [0], [1], [0, 0, 1, 1], [], []>} : vector<32x32xf32>, vector<32x9xf32>, vector<32x9xf32> -> vector<32x9xf32>
    %35 = arith.addf %31, %34 : vector<32x9xf32>
    %c0_18 = arith.constant 0 : index
    %c0_19 = arith.constant 0 : index
    %c0_20 = arith.constant 0 : index
    %36 = vector.load %arg8[%c0_18, %c0_19, %c0_20] : memref<4x32x9xf32, #tpu.memory_space<vmem>>, vector<1x32x9xf32>
    %37 = vector.shape_cast %36 : vector<1x32x9xf32> to vector<32x9xf32>
    %38 = vector.shape_cast %35 : vector<32x9xf32> to vector<1x32x9xf32>
    tpu.vector_store %arg8[%c0_18, %c0_19, %c0_20], %38 {strides = array<i32>} : memref<4x32x9xf32, #tpu.memory_space<vmem>>, vector<1x32x9xf32>,
    %c0_21 = arith.constant 0 : index
    %c0_22 = arith.constant 0 : index
    %c0_23 = arith.constant 0 : index
    %39 = vector.load %arg7[%c0_21, %c0_22, %c0_23] : memref<4x32x1xf32, #tpu.memory_space<vmem>>, vector<1x32x1xf32>
    %40 = vector.shape_cast %39 : vector<1x32x1xf32> to vector<32x1xf32>
    %41 = vector.shape_cast %21 : vector<32x1xf32> to vector<1x32x1xf32>
    tpu.vector_store %arg7[%c0_21, %c0_22, %c0_23], %41 {strides = array<i32>} : memref<4x32x1xf32, #tpu.memory_space<vmem>>, vector<1x32x1xf32>,
    %42 = vector.extract_strided_slice %5 {offsets = [0, 1], sizes = [32, 1], strides = [1, 1]} : vector<32x4xf32> to vector<32x1xf32>
    %43 = vector.extract_strided_slice %6 {offsets = [1, 0], sizes = [1, 32], strides = [1, 1]} : vector<4x32xf32> to vector<1x32xf32>
    %44 = vector.broadcast %42 : vector<32x1xf32> to vector<32x32xf32>
    %45 = vector.broadcast %43 : vector<1x32xf32> to vector<32x32xf32>
    %46 = arith.addf %44, %45 : vector<32x32xf32>
    %cst_24 = arith.constant 0.000000e+00 : f32
    %47 = vector.broadcast %cst_24 : f32 to vector<32x32xf32>
    %48 = arith.cmpf ogt, %46, %47 : vector<32x32xf32>
    %cst_25 = arith.constant 2.000000e-01 : f32
    %49 = vector.broadcast %cst_25 : f32 to vector<32x32xf32>
    %50 = arith.mulf %49, %46 : vector<32x32xf32>
    %51 = arith.select %48, %46, %50 : vector<32x32xi1>, vector<32x32xf32>
    %c1 = arith.constant 1 : index
    %c0_26 = arith.constant 0 : index
    %c0_27 = arith.constant 0 : index
    %52 = vector.load %arg7[%c1, %c0_26, %c0_27] : memref<4x32x1xf32, #tpu.memory_space<vmem>>, vector<1x32x1xf32>
    %53 = vector.shape_cast %52 : vector<1x32x1xf32> to vector<32x1xf32>
    %cst_28 = arith.constant dense<0xFF800000> : vector<32xf32>
    %54 = vector.multi_reduction <maximumf>, %51, %cst_28 [1] : vector<32x32xf32> to vector<32xf32>
    %55 = vector.shape_cast %54 : vector<32xf32> to vector<32x1xf32>
    %56 = arith.maximumf %53, %55 : vector<32x1xf32>
    %57 = vector.broadcast %56 : vector<32x1xf32> to vector<32x32xf32>
    %58 = arith.subf %51, %57 : vector<32x32xf32>
    %59 = math.exp %58 : vector<32x32xf32>
    %60 = arith.mulf %59, %4 : vector<32x32xf32>
    %61 = arith.subf %53, %56 : vector<32x1xf32>
    %62 = math.exp %61 : vector<32x1xf32>
    %c1_29 = arith.constant 1 : index
    %c0_30 = arith.constant 0 : index
    %c0_31 = arith.constant 0 : index
    %63 = vector.load %arg8[%c1_29, %c0_30, %c0_31] : memref<4x32x9xf32, #tpu.memory_space<vmem>>, vector<1x32x9xf32>
    %64 = vector.shape_cast %63 : vector<1x32x9xf32> to vector<32x9xf32>
    %65 = vector.broadcast %62 : vector<32x1xf32> to vector<32x9xf32>
    %66 = arith.mulf %65, %64 : vector<32x9xf32>
    %c1_32 = arith.constant 1 : index
    %c0_33 = arith.constant 0 : index
    %c0_34 = arith.constant 0 : index
    %67 = vector.load %arg4[%c1_32, %c0_33, %c0_34] : memref<4x32x9xf32, #tpu.memory_space<vmem>>, vector<1x32x9xf32>
    %68 = vector.shape_cast %67 : vector<1x32x9xf32> to vector<32x9xf32>
    %cst_35 = arith.constant dense<0.000000e+00> : vector<32x9xf32>
    %69 = tpu.matmul %60, %68, %cst_35 {dimension_numbers = #tpu.dot_dimension_numbers<[1], [0], [0], [1], [0, 0, 1, 1], [], []>} : vector<32x32xf32>, vector<32x9xf32>, vector<32x9xf32> -> vector<32x9xf32>
    %70 = arith.addf %66, %69 : vector<32x9xf32>
    %c1_36 = arith.constant 1 : index
    %c0_37 = arith.constant 0 : index
    %c0_38 = arith.constant 0 : index
    %71 = vector.load %arg8[%c1_36, %c0_37, %c0_38] : memref<4x32x9xf32, #tpu.memory_space<vmem>>, vector<1x32x9xf32>
    %72 = vector.shape_cast %71 : vector<1x32x9xf32> to vector<32x9xf32>
    %73 = vector.shape_cast %70 : vector<32x9xf32> to vector<1x32x9xf32>
    tpu.vector_store %arg8[%c1_36, %c0_37, %c0_38], %73 {strides = array<i32>} : memref<4x32x9xf32, #tpu.memory_space<vmem>>, vector<1x32x9xf32>,
    %c1_39 = arith.constant 1 : index
    %c0_40 = arith.constant 0 : index
    %c0_41 = arith.constant 0 : index
    %74 = vector.load %arg7[%c1_39, %c0_40, %c0_41] : memref<4x32x1xf32, #tpu.memory_space<vmem>>, vector<1x32x1xf32>
    %75 = vector.shape_cast %74 : vector<1x32x1xf32> to vector<32x1xf32>
    %76 = vector.shape_cast %56 : vector<32x1xf32> to vector<1x32x1xf32>
    tpu.vector_store %arg7[%c1_39, %c0_40, %c0_41], %76 {strides = array<i32>} : memref<4x32x1xf32, #tpu.memory_space<vmem>>, vector<1x32x1xf32>,
    %77 = vector.extract_strided_slice %5 {offsets = [0, 2], sizes = [32, 1], strides = [1, 1]} : vector<32x4xf32> to vector<32x1xf32>
    %78 = vector.extract_strided_slice %6 {offsets = [2, 0], sizes = [1, 32], strides = [1, 1]} : vector<4x32xf32> to vector<1x32xf32>
    %79 = vector.broadcast %77 : vector<32x1xf32> to vector<32x32xf32>
    %80 = vector.broadcast %78 : vector<1x32xf32> to vector<32x32xf32>
    %81 = arith.addf %79, %80 : vector<32x32xf32>
    %cst_42 = arith.constant 0.000000e+00 : f32
    %82 = vector.broadcast %cst_42 : f32 to vector<32x32xf32>
    %83 = arith.cmpf ogt, %81, %82 : vector<32x32xf32>
    %cst_43 = arith.constant 2.000000e-01 : f32
    %84 = vector.broadcast %cst_43 : f32 to vector<32x32xf32>
    %85 = arith.mulf %84, %81 : vector<32x32xf32>
    %86 = arith.select %83, %81, %85 : vector<32x32xi1>, vector<32x32xf32>
    %c2 = arith.constant 2 : index
    %c0_44 = arith.constant 0 : index
    %c0_45 = arith.constant 0 : index
    %87 = vector.load %arg7[%c2, %c0_44, %c0_45] : memref<4x32x1xf32, #tpu.memory_space<vmem>>, vector<1x32x1xf32>
    %88 = vector.shape_cast %87 : vector<1x32x1xf32> to vector<32x1xf32>
    %cst_46 = arith.constant dense<0xFF800000> : vector<32xf32>
    %89 = vector.multi_reduction <maximumf>, %86, %cst_46 [1] : vector<32x32xf32> to vector<32xf32>
    %90 = vector.shape_cast %89 : vector<32xf32> to vector<32x1xf32>
    %91 = arith.maximumf %88, %90 : vector<32x1xf32>
    %92 = vector.broadcast %91 : vector<32x1xf32> to vector<32x32xf32>
    %93 = arith.subf %86, %92 : vector<32x32xf32>
    %94 = math.exp %93 : vector<32x32xf32>
    %95 = arith.mulf %94, %4 : vector<32x32xf32>
    %96 = arith.subf %88, %91 : vector<32x1xf32>
    %97 = math.exp %96 : vector<32x1xf32>
    %c2_47 = arith.constant 2 : index
    %c0_48 = arith.constant 0 : index
    %c0_49 = arith.constant 0 : index
    %98 = vector.load %arg8[%c2_47, %c0_48, %c0_49] : memref<4x32x9xf32, #tpu.memory_space<vmem>>, vector<1x32x9xf32>
    %99 = vector.shape_cast %98 : vector<1x32x9xf32> to vector<32x9xf32>
    %100 = vector.broadcast %97 : vector<32x1xf32> to vector<32x9xf32>
    %101 = arith.mulf %100, %99 : vector<32x9xf32>
    %c2_50 = arith.constant 2 : index
    %c0_51 = arith.constant 0 : index
    %c0_52 = arith.constant 0 : index
    %102 = vector.load %arg4[%c2_50, %c0_51, %c0_52] : memref<4x32x9xf32, #tpu.memory_space<vmem>>, vector<1x32x9xf32>
    %103 = vector.shape_cast %102 : vector<1x32x9xf32> to vector<32x9xf32>
    %cst_53 = arith.constant dense<0.000000e+00> : vector<32x9xf32>
    %104 = tpu.matmul %95, %103, %cst_53 {dimension_numbers = #tpu.dot_dimension_numbers<[1], [0], [0], [1], [0, 0, 1, 1], [], []>} : vector<32x32xf32>, vector<32x9xf32>, vector<32x9xf32> -> vector<32x9xf32>
    %105 = arith.addf %101, %104 : vector<32x9xf32>
    %c2_54 = arith.constant 2 : index
    %c0_55 = arith.constant 0 : index
    %c0_56 = arith.constant 0 : index
    %106 = vector.load %arg8[%c2_54, %c0_55, %c0_56] : memref<4x32x9xf32, #tpu.memory_space<vmem>>, vector<1x32x9xf32>
    %107 = vector.shape_cast %106 : vector<1x32x9xf32> to vector<32x9xf32>
    %108 = vector.shape_cast %105 : vector<32x9xf32> to vector<1x32x9xf32>
    tpu.vector_store %arg8[%c2_54, %c0_55, %c0_56], %108 {strides = array<i32>} : memref<4x32x9xf32, #tpu.memory_space<vmem>>, vector<1x32x9xf32>,
    %c2_57 = arith.constant 2 : index
    %c0_58 = arith.constant 0 : index
    %c0_59 = arith.constant 0 : index
    %109 = vector.load %arg7[%c2_57, %c0_58, %c0_59] : memref<4x32x1xf32, #tpu.memory_space<vmem>>, vector<1x32x1xf32>
    %110 = vector.shape_cast %109 : vector<1x32x1xf32> to vector<32x1xf32>
    %111 = vector.shape_cast %91 : vector<32x1xf32> to vector<1x32x1xf32>
    tpu.vector_store %arg7[%c2_57, %c0_58, %c0_59], %111 {strides = array<i32>} : memref<4x32x1xf32, #tpu.memory_space<vmem>>, vector<1x32x1xf32>,
    %112 = vector.extract_strided_slice %5 {offsets = [0, 3], sizes = [32, 1], strides = [1, 1]} : vector<32x4xf32> to vector<32x1xf32>
    %113 = vector.extract_strided_slice %6 {offsets = [3, 0], sizes = [1, 32], strides = [1, 1]} : vector<4x32xf32> to vector<1x32xf32>
    %114 = vector.broadcast %112 : vector<32x1xf32> to vector<32x32xf32>
    %115 = vector.broadcast %113 : vector<1x32xf32> to vector<32x32xf32>
    %116 = arith.addf %114, %115 : vector<32x32xf32>
    %cst_60 = arith.constant 0.000000e+00 : f32
    %117 = vector.broadcast %cst_60 : f32 to vector<32x32xf32>
    %118 = arith.cmpf ogt, %116, %117 : vector<32x32xf32>
    %cst_61 = arith.constant 2.000000e-01 : f32
    %119 = vector.broadcast %cst_61 : f32 to vector<32x32xf32>
    %120 = arith.mulf %119, %116 : vector<32x32xf32>
    %121 = arith.select %118, %116, %120 : vector<32x32xi1>, vector<32x32xf32>
    %c3 = arith.constant 3 : index
    %c0_62 = arith.constant 0 : index
    %c0_63 = arith.constant 0 : index
    %122 = vector.load %arg7[%c3, %c0_62, %c0_63] : memref<4x32x1xf32, #tpu.memory_space<vmem>>, vector<1x32x1xf32>
    %123 = vector.shape_cast %122 : vector<1x32x1xf32> to vector<32x1xf32>
    %cst_64 = arith.constant dense<0xFF800000> : vector<32xf32>
    %124 = vector.multi_reduction <maximumf>, %121, %cst_64 [1] : vector<32x32xf32> to vector<32xf32>
    %125 = vector.shape_cast %124 : vector<32xf32> to vector<32x1xf32>
    %126 = arith.maximumf %123, %125 : vector<32x1xf32>
    %127 = vector.broadcast %126 : vector<32x1xf32> to vector<32x32xf32>
    %128 = arith.subf %121, %127 : vector<32x32xf32>
    %129 = math.exp %128 : vector<32x32xf32>
    %130 = arith.mulf %129, %4 : vector<32x32xf32>
    %131 = arith.subf %123, %126 : vector<32x1xf32>
    %132 = math.exp %131 : vector<32x1xf32>
    %c3_65 = arith.constant 3 : index
    %c0_66 = arith.constant 0 : index
    %c0_67 = arith.constant 0 : index
    %133 = vector.load %arg8[%c3_65, %c0_66, %c0_67] : memref<4x32x9xf32, #tpu.memory_space<vmem>>, vector<1x32x9xf32>
    %134 = vector.shape_cast %133 : vector<1x32x9xf32> to vector<32x9xf32>
    %135 = vector.broadcast %132 : vector<32x1xf32> to vector<32x9xf32>
    %136 = arith.mulf %135, %134 : vector<32x9xf32>
    %c3_68 = arith.constant 3 : index
    %c0_69 = arith.constant 0 : index
    %c0_70 = arith.constant 0 : index
    %137 = vector.load %arg4[%c3_68, %c0_69, %c0_70] : memref<4x32x9xf32, #tpu.memory_space<vmem>>, vector<1x32x9xf32>
    %138 = vector.shape_cast %137 : vector<1x32x9xf32> to vector<32x9xf32>
    %cst_71 = arith.constant dense<0.000000e+00> : vector<32x9xf32>
    %139 = tpu.matmul %130, %138, %cst_71 {dimension_numbers = #tpu.dot_dimension_numbers<[1], [0], [0], [1], [0, 0, 1, 1], [], []>} : vector<32x32xf32>, vector<32x9xf32>, vector<32x9xf32> -> vector<32x9xf32>
    %140 = arith.addf %136, %139 : vector<32x9xf32>
    %c3_72 = arith.constant 3 : index
    %c0_73 = arith.constant 0 : index
    %c0_74 = arith.constant 0 : index
    %141 = vector.load %arg8[%c3_72, %c0_73, %c0_74] : memref<4x32x9xf32, #tpu.memory_space<vmem>>, vector<1x32x9xf32>
    %142 = vector.shape_cast %141 : vector<1x32x9xf32> to vector<32x9xf32>
    %143 = vector.shape_cast %140 : vector<32x9xf32> to vector<1x32x9xf32>
    tpu.vector_store %arg8[%c3_72, %c0_73, %c0_74], %143 {strides = array<i32>} : memref<4x32x9xf32, #tpu.memory_space<vmem>>, vector<1x32x9xf32>,
    %c3_75 = arith.constant 3 : index
    %c0_76 = arith.constant 0 : index
    %c0_77 = arith.constant 0 : index
    %144 = vector.load %arg7[%c3_75, %c0_76, %c0_77] : memref<4x32x1xf32, #tpu.memory_space<vmem>>, vector<1x32x1xf32>
    %145 = vector.shape_cast %144 : vector<1x32x1xf32> to vector<32x1xf32>
    %146 = vector.shape_cast %126 : vector<32x1xf32> to vector<1x32x1xf32>
    tpu.vector_store %arg7[%c3_75, %c0_76, %c0_77], %146 {strides = array<i32>} : memref<4x32x1xf32, #tpu.memory_space<vmem>>, vector<1x32x1xf32>,
    %c0_i32_78 = arith.constant 0 : i32
    %147 = arith.cmpi eq, %arg1, %c0_i32_78 : i32
    %148 = arith.extui %147 : i1 to i32
    %c0_i32_79 = arith.constant 0 : i32
    %149 = arith.cmpi ne, %148, %c0_i32_79 : i32
    scf.if %149 {
      %c0_80 = arith.constant 0 : index
      %c0_81 = arith.constant 0 : index
      %c0_82 = arith.constant 0 : index
      %150 = vector.load %arg8[%c0_80, %c0_81, %c0_82] : memref<4x32x9xf32, #tpu.memory_space<vmem>>, vector<1x32x9xf32>
      %151 = vector.shape_cast %150 : vector<1x32x9xf32> to vector<32x9xf32>
      %152 = vector.extract_strided_slice %151 {offsets = [0, 8], sizes = [32, 1], strides = [1, 1]} : vector<32x9xf32> to vector<32x1xf32>
      %153 = vector.extract_strided_slice %151 {offsets = [0, 0], sizes = [32, 8], strides = [1, 1]} : vector<32x9xf32> to vector<32x8xf32>
      %154 = vector.broadcast %152 : vector<32x1xf32> to vector<32x8xf32>
      %155 = arith.divf %153, %154 : vector<32x8xf32>
      %cst_83 = arith.constant 0.000000e+00 : f32
      %156 = vector.broadcast %cst_83 : f32 to vector<32x8xf32>
      %157 = arith.cmpf ogt, %155, %156 : vector<32x8xf32>
      %cst_84 = arith.constant 0.000000e+00 : f32
      %158 = vector.broadcast %cst_84 : f32 to vector<32x8xf32>
      %159 = arith.minimumf %155, %158 : vector<32x8xf32>
      %160 = math.exp %159 : vector<32x8xf32>
      %cst_85 = arith.constant 1.000000e+00 : f32
      %161 = vector.broadcast %cst_85 : f32 to vector<32x8xf32>
      %162 = arith.subf %160, %161 : vector<32x8xf32>
      %163 = arith.select %157, %155, %162 : vector<32x8xi1>, vector<32x8xf32>
      %c1_86 = arith.constant 1 : index
      %c0_87 = arith.constant 0 : index
      %c0_88 = arith.constant 0 : index
      %164 = vector.load %arg8[%c1_86, %c0_87, %c0_88] : memref<4x32x9xf32, #tpu.memory_space<vmem>>, vector<1x32x9xf32>
      %165 = vector.shape_cast %164 : vector<1x32x9xf32> to vector<32x9xf32>
      %166 = vector.extract_strided_slice %165 {offsets = [0, 8], sizes = [32, 1], strides = [1, 1]} : vector<32x9xf32> to vector<32x1xf32>
      %167 = vector.extract_strided_slice %165 {offsets = [0, 0], sizes = [32, 8], strides = [1, 1]} : vector<32x9xf32> to vector<32x8xf32>
      %168 = vector.broadcast %166 : vector<32x1xf32> to vector<32x8xf32>
      %169 = arith.divf %167, %168 : vector<32x8xf32>
      %cst_89 = arith.constant 0.000000e+00 : f32
      %170 = vector.broadcast %cst_89 : f32 to vector<32x8xf32>
      %171 = arith.cmpf ogt, %169, %170 : vector<32x8xf32>
      %cst_90 = arith.constant 0.000000e+00 : f32
      %172 = vector.broadcast %cst_90 : f32 to vector<32x8xf32>
      %173 = arith.minimumf %169, %172 : vector<32x8xf32>
      %174 = math.exp %173 : vector<32x8xf32>
      %cst_91 = arith.constant 1.000000e+00 : f32
      %175 = vector.broadcast %cst_91 : f32 to vector<32x8xf32>
      %176 = arith.subf %174, %175 : vector<32x8xf32>
      %177 = arith.select %171, %169, %176 : vector<32x8xi1>, vector<32x8xf32>
      %c2_92 = arith.constant 2 : index
      %c0_93 = arith.constant 0 : index
      %c0_94 = arith.constant 0 : index
      %178 = vector.load %arg8[%c2_92, %c0_93, %c0_94] : memref<4x32x9xf32, #tpu.memory_space<vmem>>, vector<1x32x9xf32>
      %179 = vector.shape_cast %178 : vector<1x32x9xf32> to vector<32x9xf32>
      %180 = vector.extract_strided_slice %179 {offsets = [0, 8], sizes = [32, 1], strides = [1, 1]} : vector<32x9xf32> to vector<32x1xf32>
      %181 = vector.extract_strided_slice %179 {offsets = [0, 0], sizes = [32, 8], strides = [1, 1]} : vector<32x9xf32> to vector<32x8xf32>
      %182 = vector.broadcast %180 : vector<32x1xf32> to vector<32x8xf32>
      %183 = arith.divf %181, %182 : vector<32x8xf32>
      %cst_95 = arith.constant 0.000000e+00 : f32
      %184 = vector.broadcast %cst_95 : f32 to vector<32x8xf32>
      %185 = arith.cmpf ogt, %183, %184 : vector<32x8xf32>
      %cst_96 = arith.constant 0.000000e+00 : f32
      %186 = vector.broadcast %cst_96 : f32 to vector<32x8xf32>
      %187 = arith.minimumf %183, %186 : vector<32x8xf32>
      %188 = math.exp %187 : vector<32x8xf32>
      %cst_97 = arith.constant 1.000000e+00 : f32
      %189 = vector.broadcast %cst_97 : f32 to vector<32x8xf32>
      %190 = arith.subf %188, %189 : vector<32x8xf32>
      %191 = arith.select %185, %183, %190 : vector<32x8xi1>, vector<32x8xf32>
      %c3_98 = arith.constant 3 : index
      %c0_99 = arith.constant 0 : index
      %c0_100 = arith.constant 0 : index
      %192 = vector.load %arg8[%c3_98, %c0_99, %c0_100] : memref<4x32x9xf32, #tpu.memory_space<vmem>>, vector<1x32x9xf32>
      %193 = vector.shape_cast %192 : vector<1x32x9xf32> to vector<32x9xf32>
      %194 = vector.extract_strided_slice %193 {offsets = [0, 8], sizes = [32, 1], strides = [1, 1]} : vector<32x9xf32> to vector<32x1xf32>
      %195 = vector.extract_strided_slice %193 {offsets = [0, 0], sizes = [32, 8], strides = [1, 1]} : vector<32x9xf32> to vector<32x8xf32>
      %196 = vector.broadcast %194 : vector<32x1xf32> to vector<32x8xf32>
      %197 = arith.divf %195, %196 : vector<32x8xf32>
      %cst_101 = arith.constant 0.000000e+00 : f32
      %198 = vector.broadcast %cst_101 : f32 to vector<32x8xf32>
      %199 = arith.cmpf ogt, %197, %198 : vector<32x8xf32>
      %cst_102 = arith.constant 0.000000e+00 : f32
      %200 = vector.broadcast %cst_102 : f32 to vector<32x8xf32>
      %201 = arith.minimumf %197, %200 : vector<32x8xf32>
      %202 = math.exp %201 : vector<32x8xf32>
      %cst_103 = arith.constant 1.000000e+00 : f32
      %203 = vector.broadcast %cst_103 : f32 to vector<32x8xf32>
      %204 = arith.subf %202, %203 : vector<32x8xf32>
      %205 = arith.select %199, %197, %204 : vector<32x8xi1>, vector<32x8xf32>
      %206 = tpu.concatenate %163, %177, %191, %205 in 1 : vector<32x8xf32>, vector<32x8xf32>, vector<32x8xf32>, vector<32x8xf32> -> vector<32x32xf32>
      %c0_104 = arith.constant 0 : index
      %c0_105 = arith.constant 0 : index
      %207 = vector.load %arg6[%c0_104, %c0_105] : memref<32x32xf32, #tpu.memory_space<vmem>>, vector<32x32xf32>
      tpu.vector_store %arg6[%c0_104, %c0_105], %206 {strides = array<i32>} : memref<32x32xf32, #tpu.memory_space<vmem>>, vector<32x32xf32>,
    } else {
    }
    return
  }
  func.func @transform_0(%arg0: i32, %arg1: i32) -> (i32, i32) {
    %c0_i32 = arith.constant 0 : i32
    %c0_i32_0 = arith.constant 0 : i32
    return %arg0, %c0_i32 : i32, i32
  }
  func.func @transform_1(%arg0: i32, %arg1: i32) -> (i32, i32) {
    %c0_i32 = arith.constant 0 : i32
    %c0_i32_0 = arith.constant 0 : i32
    return %c0_i32, %arg1 : i32, i32
  }
  func.func @transform_2(%arg0: i32, %arg1: i32) -> (i32, i32, i32) {
    %c0_i32 = arith.constant 0 : i32
    %c0_i32_0 = arith.constant 0 : i32
    %c0_i32_1 = arith.constant 0 : i32
    return %c0_i32, %arg1, %c0_i32_0 : i32, i32, i32
  }
  func.func @transform_3(%arg0: i32, %arg1: i32) -> (i32, i32) {
    %c0_i32 = arith.constant 0 : i32
    return %arg0, %arg1 : i32, i32
  }
  func.func @transform_4(%arg0: i32, %arg1: i32) -> (i32, i32) {
    %c0_i32 = arith.constant 0 : i32
    %c0_i32_0 = arith.constant 0 : i32
    return %arg0, %c0_i32 : i32, i32
  }
}

</mosaic_0001>

<bundles_post_ra>
// kernel: tpu_custom_call.1
= control target key start
LH: loop header
LB: loop body
LE: loop exit
PB: predicated region body
PF: predicated region fallthrough
CT: control target
= control target key end

     0   :  { %v1685_v1 = vmov 1   ;;  %v1686_v2 = vmov 0   ;;  %s2240_s0 = inlined_call_operand.vmem [shape: f32[32,4], index: 0, kind: input, shape index: {}]   ;;  %s2241_s1 = inlined_call_operand.vmem [shape: f32[4,32], index: 1, kind: input, shape index: {}]   ;;  %s2242_s2 = inlined_call_operand.vmem [shape: f32[4,32,9], index: 2, kind: input, shape index: {}]   ;;  %s2243_s3 = inlined_call_operand.vmem [shape: s8[32,32], index: 3, kind: input, shape index: {}]   ;;  %s2244_s4 = inlined_call_operand.hbm [shape: f32[32,32], index: 4, kind: output, shape index: {}]  }
   0x1   :  { %v65_v0 = vld [vmem:[%s2240_s0] sm:$0xff]  ;;  %1521 = vset.pattern.permute.xlu1 %v1685_v1  ;;  %1520 = vset.pattern.permute.xlu0 %v1686_v2 }
   0x2   :  { %9 = vsyncpa [#allocation5], 0  ;;  %323 = vperm.xlu1 %1521, %v65_v0   ;;  %72 = vperm.xlu0 %1520, %v65_v0   ;;  %v66_v3 = vld [vmem:[%s2240_s0 + $0x8] sm:$0xff]  ;;  %v67_v4 = vld [vmem:[%s2240_s0 + $0x10] sm:$0xff]  ;;  %v1687_v6 = vmov 2   ;;  %v1688_v7 = vmov 3   ;;  %v90_v8 = vlaneseq }
   0x3   :  { %v68_v5 = vld [vmem:[%s2240_s0 + $0x18] sm:$0xff]  ;;  %v1740_v11 = vld [vmem:[%s2241_s1] sm:$0xf]  ;;  %vm114_vm1 = vcmask 261120   ;;  %vm22_vm5 = vcmask 7168   ;;  %v1689_v34 = vmov -inf  }
   0x4   :  { %v1734_v9 = vshrl.u32 %v90_v8, 7  ;;  %23 = vst.msk [vmem:[#allocation2] sm:$0xff] %vm22_vm5, %v1689_v34  ;;  %24 = vst.msk [vmem:[#allocation2 + $0x8] sm:$0xff] %vm22_vm5, %v1689_v34  ;;  %s1693_s28 = smov 16   ;;  %s1694_s29 = smov 24  }
   0x5   :  { %25 = vst.msk [vmem:[#allocation2 + $0x10] sm:$0xff] %vm22_vm5, %v1689_v34  ;;  %26 = vst.msk [vmem:[#allocation2 + $0x18] sm:$0xff] %vm22_vm5, %v1689_v34  ;;  %s1695_s30 = smov [#allocation4]  }
   0x6   :  { %327 = vperm.xlu1 %1521, %v66_v3   ;;  %77 = vperm.xlu0 %1520, %v66_v3   ;;  %v92_v10 = vsub.s32 0, %v1734_v9  ;;  %v340_v12 = vsub.s32 1, %v1734_v9  ;;  %27 = vst.msk [vmem:[#allocation2 + $0x20] sm:$0xff] %vm22_vm5, %v1689_v34  ;;  %28 = vst.msk [vmem:[#allocation2 + $0x28] sm:$0xff] %vm22_vm5, %v1689_v34  ;;  %v588_v40 = vsub.s32 2, %v1734_v9  ;;  %v836_v53 = vsub.s32 3, %v1734_v9 }
   0x7   :  { %29 = vst.msk [vmem:[#allocation2 + $0x30] sm:$0xff] %vm22_vm5, %v1689_v34  ;;  %30 = vst.msk [vmem:[#allocation2 + $0x38] sm:$0xff] %vm22_vm5, %v1689_v34  ;;  %s1365_s5 = sshll.u32 %s1695_s30, 4  ;;  %s1366_s5 = int_to_ptr.vmem [resolvable:$true] %s1365_s5 }
   0x8   :  { %v93_v13 = vrot.slane %v1740_v11, %v92_v10  ;;  %v341_v14 = vrot.slane %v1740_v11, %v340_v12  ;;  %31 = vst.msk [vmem:[#allocation2 + $0x40] sm:$0xff] %vm22_vm5, %v1689_v34  ;;  %32 = vst.msk [vmem:[#allocation2 + $0x48] sm:$0xff] %vm22_vm5, %v1689_v34  ;;  %v589_v49 = vrot.slane %v1740_v11, %v588_v40  ;;  %s1663_s6 = scalar_lea.vmem %s1366_s5, 512  ;;  %p1668_p1 = scmp.lt.s32.totalorder %s1366_s5, %s1366_s5 }
   0x9   :  { %33 = vst.msk [vmem:[#allocation2 + $0x50] sm:$0xff] %vm22_vm5, %v1689_v34  ;;  %34 = vst.msk [vmem:[#allocation2 + $0x58] sm:$0xff] %vm22_vm5, %v1689_v34  ;;  %p1664_p0 = scmp.ne.s32.totalorder %s1366_s5, %s1663_s6  ;;  %p1669_p2 = scmp.lt.s32.totalorder %s1663_s6, %s1663_s6 }
   0xa   :  { %1522 = vset.pattern.permute.xlu1 %v1686_v2  ;;  %82 = vperm.xlu0 %1520, %v67_v4   ;;  %35 = vst.msk [vmem:[#allocation2 + $0x60] sm:$0xff] %vm22_vm5, %v1689_v34  ;;  %36 = vst.msk [vmem:[#allocation2 + $0x68] sm:$0xff] %vm22_vm5, %v1689_v34 }
   0xb   :  { %87 = vperm.xlu1 %1522, %v68_v5   ;;  %37 = vst.msk [vmem:[#allocation2 + $0x70] sm:$0xff] %vm22_vm5, %v1689_v34  ;;  %38 = vst.msk [vmem:[#allocation2 + $0x78] sm:$0xff] %vm22_vm5, %v1689_v34  ;;  %v1830_v40 = vld [vmem:[#allocation2] sm:$0xff]  ;;  %p1670_p3 = por %p1669_p2, %p1668_p1 }
   0xd   :  { %p1671_p4 = pnand %p1670_p3, %p1664_p0 }
   0xe   :  { %1523 = vset.pattern.permute.xlu0 %v1685_v1 }
   0xf   :  { %1524 = vset.pattern.permute.xlu1 %v1685_v1  ;;  %331 = vperm.xlu0 %1523, %v67_v4  }
  0x10   :  { %335 = vperm.xlu1 %1524, %v68_v5  }
  0x13   :  { %1526 = vset.pattern.permute.xlu0 %v1687_v6 }
  0x14   :  { %1525 = vset.pattern.permute.xlu1 %v1687_v6  ;;  %575 = vperm.xlu0 %1526, %v66_v3  }
  0x15   :  { %571 = vperm.xlu1 %1525, %v65_v0  }
  0x18   :  { %579 = vperm.xlu0 %1526, %v67_v4  }
  0x19   :  { %1527 = vset.pattern.permute.xlu1 %v1688_v7 }
  0x1a   :  { %819 = vperm.xlu1 %1527, %v65_v0   ;;  %v837_v0 = vrot.slane %v1740_v11, %v836_v53 }
  0x1c   :  { %1529 = vset.pattern.permute.xlu0 %v1688_v7 }
  0x1d   :  { %827 = vperm.xlu0 %1529, %v67_v4  }
  0x1e   :  { %823 = vperm.xlu1 %1527, %v66_v3  }
  0x21   :  { %1531 = vset.pattern.permute.xlu0 %v1686_v2 }
  0x22   :  { %1528 = vset.pattern.permute.xlu1 %v1687_v6 }
  0x23   :  { %583 = vperm.xlu1 %1528, %v68_v5  }
  0x27   :  { %1530 = vset.pattern.permute.xlu1 %v1688_v7 }
  0x28   :  { %831 = vperm.xlu1 %1530, %v68_v5  }
  0x2c   :  { %1532 = vset.pattern.permute.xlu1 %v1686_v2 }
  0x7d   :  { %v73_v15 = vpop.permute.xlu0 %72  ;;  %v324_v16 = vpop.permute.xlu1 %323 }
  0x7e   :  { %v94_v17 = vadd.f32 %v93_v13, %v73_v15  ;;  %v342_v18 = vadd.f32 %v341_v14, %v324_v16 }
  0x80   :  { %v102_v19 = vmul.f32 0.2, %v94_v17  ;;  %vm98_vm0 = vcmp.gt.f32.partialorder %v94_v17, 0.0  ;;  %v350_v26 = vmul.f32 0.2, %v342_v18  ;;  %vm346_vm4 = vcmp.gt.f32.partialorder %v342_v18, 0.0 }
  0x81   :  { %v78_v20 = vpop.permute.xlu0 %77  ;;  %v328_v21 = vpop.permute.xlu1 %327 }
  0x82   :  { %v95_v22 = vadd.f32 %v93_v13, %v78_v20  ;;  %v343_v23 = vadd.f32 %v341_v14, %v328_v21  ;;  %v1745_v24 = vsel %vm98_vm0, %v94_v17, %v102_v19  ;;  %v1774_v39 = vsel %vm346_vm4, %v342_v18, %v350_v26 }
  0x83   :  { %v115_v25 = vsel %vm114_vm1, %v1745_v24, -inf  ;;  %v363_v45 = vsel %vm114_vm1, %v1774_v39, -inf }
  0x84   :  { %v103_v27 = vmul.f32 0.2, %v95_v22  ;;  %116 = vmax.xlane.f32.xlu1 %v115_v25  ;;  %vm99_vm2 = vcmp.gt.f32.partialorder %v95_v22, 0.0  ;;  %vm347_vm3 = vcmp.gt.f32.partialorder %v343_v23, 0.0  ;;  %v351_v28 = vmul.f32 0.2, %v343_v23 }
  0x85   :  { %v83_v29 = vpop.permute.xlu0 %82 }
  0x86   :  { %v96_v30 = vadd.f32 %v93_v13, %v83_v29  ;;  %v88_v31 = vpop.permute.xlu1 %87  ;;  %v1749_v32 = vsel %vm99_vm2, %v95_v22, %v103_v27  ;;  %v1751_v33 = vsel %vm347_vm3, %v343_v23, %v351_v28  ;;  %vm39_vm3 = vcmask 72704  }
  0x87   :  { %v97_v35 = vadd.f32 %v93_v13, %v88_v31  ;;  %v118_v36 = vsel %vm114_vm1, %v1749_v32, -inf  ;;  %v366_v37 = vsel %vm114_vm1, %v1751_v33, -inf }
  0x88   :  { %v104_v38 = vmul.f32 0.2, %v96_v30  ;;  %119 = vmax.xlane.f32.xlu0 %v118_v36  ;;  %367 = vmax.xlane.f32.xlu1 %v366_v37  ;;  %vm100_vm7 = vcmp.gt.f32.partialorder %v96_v30, 0.0 }
  0x89   :  { %v105_v41 = vmul.f32 0.2, %v97_v35  ;;  %vm101_vm6 = vcmp.gt.f32.partialorder %v97_v35, 0.0 }
  0x8a   :  { %v332_v42 = vpop.permute.xlu0 %331  ;;  %v1784_v50 = vsel %vm100_vm7, %v96_v30, %v104_v38 }
  0x8b   :  { %v336_v43 = vpop.permute.xlu1 %335  ;;  %v344_v44 = vadd.f32 %v341_v14, %v332_v42  ;;  %v1779_v46 = vsel %vm101_vm6, %v97_v35, %v105_v41  ;;  %v121_v55 = vsel %vm114_vm1, %v1784_v50, -inf }
  0x8c   :  { %v345_v47 = vadd.f32 %v341_v14, %v336_v43  ;;  %364 = vmax.xlane.f32.xlu0 %v363_v45  ;;  %v124_v48 = vsel %vm114_vm1, %v1779_v46, -inf  ;;  %v1835_v43 = vld [vmem:[#allocation2 + $0x8] sm:$0xff] }
  0x8d   :  { %v352_v51 = vmul.f32 0.2, %v344_v44  ;;  %125 = vmax.xlane.f32.xlu1 %v124_v48  ;;  %vm348_vm8 = vcmp.gt.f32.partialorder %v344_v44, 0.0 }
  0x8e   :  { %v353_v52 = vmul.f32 0.2, %v345_v47  ;;  %vm349_vm9 = vcmp.gt.f32.partialorder %v345_v47, 0.0 }
  0x8f   :  { %v576_v54 = vpop.permute.xlu0 %575  ;;  %v1789_v56 = vsel %vm348_vm8, %v344_v44, %v352_v51  ;;  %v1837_v44 = vld [vmem:[#allocation2 + $0x28] sm:$0xff]  ;;  %v1846_v51 = vld [vmem:[#allocation2 + $0x20] sm:$0xff] }
  0x90   :  { %v591_v57 = vadd.f32 %v589_v49, %v576_v54  ;;  %122 = vmax.xlane.f32.xlu0 %v121_v55  ;;  %v572_v58 = vpop.permute.xlu1 %571  ;;  %v1791_v59 = vsel %vm349_vm9, %v345_v47, %v353_v52  ;;  %v369_v62 = vsel %vm114_vm1, %v1789_v56, -inf  ;;  %v1851_v52 = vld [vmem:[#allocation2 + $0x18] sm:$0xff] }
  0x91   :  { %v590_v60 = vadd.f32 %v589_v49, %v572_v58  ;;  %v372_v61 = vsel %vm114_vm1, %v1791_v59, -inf  ;;  %v1859_v58 = vld [vmem:[#allocation2 + $0x10] sm:$0xff] }
  0x92   :  { %v599_v63 = vmul.f32 0.2, %v591_v57  ;;  %373 = vmax.xlane.f32.xlu1 %v372_v61  ;;  %vm595_vm10 = vcmp.gt.f32.partialorder %v591_v57, 0.0  ;;  %v1866_v61 = vld [vmem:[#allocation2 + $0x38] sm:$0xff] }
  0x93   :  { %v598_v1 = vmul.f32 0.2, %v590_v60  ;;  %vm594_vm11 = vcmp.gt.f32.partialorder %v590_v60, 0.0  ;;  %v580_v2 = vpop.permute.xlu0 %579 }
  0x94   :  { %v1798_v3 = vsel %vm595_vm10, %v591_v57, %v599_v63  ;;  %370 = vmax.xlane.f32.xlu0 %v369_v62  ;;  %v592_v4 = vadd.f32 %v589_v49, %v580_v2 }
  0x95   :  { %v820_v5 = vpop.permute.xlu1 %819  ;;  %v614_v6 = vsel %vm114_vm1, %v1798_v3, -inf  ;;  %v1802_v7 = vsel %vm594_vm11, %v590_v60, %v598_v1  ;;  %v210_v1 = vld [vmem:[%s2242_s2 + $0x18] sm:$0xff] }
  0x96   :  { %v838_v8 = vadd.f32 %v837_v0, %v820_v5  ;;  %615 = vmax.xlane.f32.xlu1 %v614_v6  ;;  %v611_v9 = vsel %vm114_vm1, %v1802_v7, -inf  ;;  %v600_v10 = vmul.f32 0.2, %v592_v4  ;;  %vm596_vm12 = vcmp.gt.f32.partialorder %v592_v4, 0.0  ;;  %1452 = vmatprep.subr.mxu0 %v210_v1  ;;  %v209_v6 = vld [vmem:[%s2242_s2 + $0x10] sm:$0xff] }
  0x97   :  { %1453 = vmatpush3.msra.mxu0 %v210_v1 }
  0x98   :  { %v846_v11 = vmul.f32 0.2, %v838_v8  ;;  %612 = vmax.xlane.f32.xlu0 %v611_v9  ;;  %vm842_vm13 = vcmp.gt.f32.partialorder %v838_v8, 0.0  ;;  %v828_v12 = vpop.permute.xlu0 %827  ;;  %v1808_v17 = vsel %vm596_vm12, %v592_v4, %v600_v10  ;;  %v1882_v4 = vld [vmem:[#allocation2 + $0x48] sm:$0xff]  ;;  %1454 = vmatprep.subr.mxu0 %v209_v6  ;;  %v1892_v10 = vld [vmem:[#allocation2 + $0x40] sm:$0xff] }
  0x99   :  { %v824_v13 = vpop.permute.xlu1 %823  ;;  %v840_v14 = vadd.f32 %v837_v0, %v828_v12  ;;  %v617_v21 = vsel %vm114_vm1, %v1808_v17, -inf  ;;  %1455 = vmatpush3.msra.mxu0 %v209_v6 }
  0x9a   :  { %v839_v15 = vadd.f32 %v837_v0, %v824_v13  ;;  %v1806_v16 = vsel %vm842_vm13, %v838_v8, %v846_v11  ;;  %v208_v11 = vld [vmem:[%s2242_s2 + $0x8] sm:$0xff] }
  0x9b   :  { %v859_v18 = vsel %vm114_vm1, %v1806_v16, -inf  ;;  %v848_v19 = vmul.f32 0.2, %v840_v14  ;;  %vm844_vm14 = vcmp.gt.f32.partialorder %v840_v14, 0.0  ;;  %1456 = vmatprep.subr.mxu0 %v208_v11 }
  0x9c   :  { %v847_v20 = vmul.f32 0.2, %v839_v15  ;;  %860 = vmax.xlane.f32.xlu0 %v859_v18  ;;  %vm843_vm15 = vcmp.gt.f32.partialorder %v839_v15, 0.0  ;;  %1457 = vmatpush3.msra.mxu0 %v208_v11  ;;  %v1912_v18 = vld [vmem:[#allocation2 + $0x60] sm:$0xff] }
  0x9d   :  { %v1816_v25 = vsel %vm844_vm14, %v840_v14, %v848_v19  ;;  %v207_v14 = vld [vmem:[%s2242_s2] sm:$0xff]  ;;  %v1383_v19 = vld [vmem:[%s2242_s2 + $0x38] sm:$0xff] }
  0x9e   :  { %v584_v22 = vpop.permute.xlu1 %583  ;;  %v1814_v23 = vsel %vm843_vm15, %v839_v15, %v847_v20  ;;  %v865_v29 = vsel %vm114_vm1, %v1816_v25, -inf  ;;  %1458 = vmatprep.subr.mxu0 %v207_v14  ;;  %1466 = vmatprep.subr.mxu1 %v1383_v19 }
  0x9f   :  { %v593_v26 = vadd.f32 %v589_v49, %v584_v22  ;;  %v862_v27 = vsel %vm114_vm1, %v1814_v23, -inf  ;;  %1459 = vmatpush3.msra.mxu0 %v207_v14  ;;  %1467 = vmatpush3.msra.mxu1 %v1383_v19  ;;  %v1382_v22 = vld [vmem:[%s2242_s2 + $0x30] sm:$0xff]  ;;  %v2003_v19 = vld [vmem:[%s2242_s2 + $0x58] sm:$0xff] }
  0xa0   :  { %863 = vmax.xlane.f32.xlu1 %v862_v27  ;;  %618 = vmax.xlane.f32.xlu0 %v617_v21  ;;  %v1927_v27 = vld [vmem:[#allocation2 + $0x68] sm:$0xff] }
  0xa1   :  { %v601_v28 = vmul.f32 0.2, %v593_v26  ;;  %vm597_vm0 = vcmp.gt.f32.partialorder %v593_v26, 0.0  ;;  %1468 = vmatprep.subr.mxu1 %v1382_v22  ;;  %1480 = vmatprep.subr.mxu0 %v2003_v19 }
  0xa2   :  { %1469 = vmatpush3.msra.mxu1 %v1382_v22 }
  0xa3   :  { %v832_v30 = vpop.permute.xlu1 %831  ;;  %v1822_v31 = vsel %vm597_vm0, %v593_v26, %v601_v28  ;;  %v1929_v28 = vld [vmem:[#allocation2 + $0x50] sm:$0xff]  ;;  %vm1341_vm0 = vcmask 64512  }
  0xa4   :  { %v841_v34 = vadd.f32 %v837_v0, %v832_v30  ;;  %v620_v35 = vsel %vm114_vm1, %v1822_v31, -inf  ;;  %866 = vmax.xlane.f32.xlu0 %v865_v29  ;;  %v1871_v0 = vld [vmem:[#allocation2 + $0x30] sm:$0xff] }
  0xa5   :  { %621 = vmax.xlane.f32.xlu1 %v620_v35 }
  0xa6   :  { %v849_v36 = vmul.f32 0.2, %v841_v34  ;;  %vm845_vm2 = vcmp.gt.f32.partialorder %v841_v34, 0.0 }
  0xa8   :  { %v1826_v37 = vsel %vm845_vm2, %v841_v34, %v849_v36  ;;  %v1381_v34 = vld [vmem:[%s2242_s2 + $0x28] sm:$0xff] }
  0xa9   :  { %v868_v38 = vsel %vm114_vm1, %v1826_v37, -inf  ;;  %1470 = vmatprep.subr.mxu1 %v1381_v34 }
  0xaa   :  { %869 = vmax.xlane.f32.xlu1 %v868_v38  ;;  %1471 = vmatpush3.msra.mxu1 %v1381_v34 }
 0x10d   :  { %v117_v41 = vpop.xlane.xlu1 %116 }
 0x10e   :  { %v1833_v42 = vmax.f32 %v1830_v40, %v117_v41 }
 0x110   :  { %318 = vst.msk [vmem:[#allocation2] sm:$0xff] %vm22_vm5, %v1833_v42  ;;  %133 = vperm.xlu0 %1531, %v1833_v42   ;;  %v167_v38 = vsub.f32 %v1830_v40, %v1833_v42  ;;  %v1957_v40 = vld [vmem:[#allocation2 + $0x58] sm:$0xff] }
 0x111   :  { %v120_v45 = vpop.xlane.xlu0 %119  ;;  %v368_v47 = vpop.xlane.xlu1 %367 }
 0x112   :  { %v128_v48 = vmax.f32 %v1835_v43, %v120_v45  ;;  %v1844_v49 = vmax.f32 %v1837_v44, %v368_v47  ;;  %v1380_v45 = vld [vmem:[%s2242_s2 + $0x20] sm:$0xff]  ;;  %v1948_v47 = vld [vmem:[#allocation2 + $0x70] sm:$0xff] }
 0x113   :  { %1472 = vmatprep.subr.mxu1 %v1380_v45 }
 0x114   :  { %319 = vst.msk [vmem:[#allocation2 + $0x8] sm:$0xff] %vm22_vm5, %v128_v48  ;;  %567 = vst.msk [vmem:[#allocation2 + $0x28] sm:$0xff] %vm22_vm5, %v1844_v49  ;;  %138 = vperm.xlu1 %1532, %v128_v48   ;;  %v168_v20 = vsub.f32 %v1835_v43, %v128_v48  ;;  %1473 = vmatpush3.msra.mxu1 %v1380_v45 }
 0x115   :  { %v365_v53 = vpop.xlane.xlu0 %364 }
 0x116   :  { %v1854_v54 = vmax.f32 %v1846_v51, %v365_v53  ;;  %v126_v55 = vpop.xlane.xlu1 %125  ;;  %v173_v29 = vmul.f32 1.442695, %v168_v20  ;;  %v171_v53 = vmul.f32 1.442695, %v167_v38 }
 0x117   :  { %v1857_v57 = vmax.f32 %v1851_v52, %v126_v55 }
 0x118   :  { %566 = vst.msk [vmem:[#allocation2 + $0x20] sm:$0xff] %vm22_vm5, %v1854_v54  ;;  %381 = vperm.xlu1 %1532, %v1854_v54   ;;  %v415_v30 = vsub.f32 %v1846_v51, %v1854_v54  ;;  %1535 = vpow2.f32 %v173_v29 }
 0x119   :  { %321 = vst.msk [vmem:[#allocation2 + $0x18] sm:$0xff] %vm22_vm5, %v1857_v57  ;;  %v123_v60 = vpop.xlane.xlu0 %122 }
 0x11a   :  { %v1869_v62 = vmax.f32 %v1859_v58, %v123_v60  ;;  %v419_v48 = vmul.f32 1.442695, %v415_v30 }
 0x11b   :  { %v374_v63 = vpop.xlane.xlu1 %373 }
 0x11c   :  { %320 = vst.msk [vmem:[#allocation2 + $0x10] sm:$0xff] %vm22_vm5, %v1869_v62  ;;  %v1879_v2 = vmax.f32 %v1866_v61, %v374_v63  ;;  %386 = vperm.xlu1 %1532, %v1844_v49   ;;  %v169_v54 = vsub.f32 %v1859_v58, %v1869_v62  ;;  %1537 = vpow2.f32 %v419_v48  ;;  %v858_v58 = vld [vmem:[#allocation2 + $0x78] sm:$0xff] }
 0x11d   :  { %v371_v5 = vpop.xlane.xlu0 %370  ;;  %1539 = vpow2.f32 %v171_v53 }
 0x11e   :  { %569 = vst.msk [vmem:[#allocation2 + $0x38] sm:$0xff] %vm22_vm5, %v1879_v2  ;;  %v1890_v8 = vmax.f32 %v1871_v0, %v371_v5  ;;  %v1690_v5 = vmov 0.0   ;;  %v175_v6 = vmul.f32 1.442695, %v169_v54  ;;  %v418_v14 = vsub.f32 %v1866_v61, %v1879_v2 }
 0x11f   :  { %v616_v9 = vpop.xlane.xlu1 %615  ;;  %41 = vst.msk [vmem:[#allocation3 + $0x8] sm:$0xff] %vm39_vm3, %v1690_v5  ;;  %40 = vst.msk [vmem:[#allocation3] sm:$0xff] %vm39_vm3, %v1690_v5 }
 0x120   :  { %v1898_v12 = vmax.f32 %v1882_v4, %v616_v9  ;;  %143 = vperm.xlu1 %1532, %v1869_v62   ;;  %568 = vst.msk [vmem:[#allocation2 + $0x30] sm:$0xff] %vm22_vm5, %v1890_v8  ;;  %v417_v51 = vsub.f32 %v1871_v0, %v1890_v8  ;;  %v416_v62 = vsub.f32 %v1837_v44, %v1844_v49  ;;  %v425_v20 = vmul.f32 1.442695, %v418_v14 }
 0x121   :  { %v613_v13 = vpop.xlane.xlu0 %612  ;;  %42 = vst.msk [vmem:[#allocation3 + $0x10] sm:$0xff] %vm39_vm3, %v1690_v5  ;;  %43 = vst.msk [vmem:[#allocation3 + $0x18] sm:$0xff] %vm39_vm3, %v1690_v5 }
 0x122   :  { %815 = vst.msk [vmem:[#allocation2 + $0x48] sm:$0xff] %vm22_vm5, %v1898_v12  ;;  %634 = vperm.xlu0 %1531, %v1898_v12   ;;  %v1910_v15 = vmax.f32 %v1892_v10, %v613_v13  ;;  %v423_v0 = vmul.f32 1.442695, %v417_v51  ;;  %v421_v13 = vmul.f32 1.442695, %v416_v62  ;;  %v664_v61 = vsub.f32 %v1882_v4, %v1898_v12 }
 0x123   :  { %44 = vst.msk [vmem:[#allocation3 + $0x20] sm:$0xff] %vm39_vm3, %v1690_v5  ;;  %45 = vst.msk [vmem:[#allocation3 + $0x28] sm:$0xff] %vm39_vm3, %v1690_v5 }
 0x124   :  { %148 = vperm.xlu1 %1532, %v1857_v57   ;;  %814 = vst.msk [vmem:[#allocation2 + $0x40] sm:$0xff] %vm22_vm5, %v1910_v15  ;;  %v663_v1 = vsub.f32 %v1892_v10, %v1910_v15  ;;  %1541 = vpow2.f32 %v423_v0  ;;  %v669_v4 = vmul.f32 1.442695, %v664_v61 }
 0x125   :  { %v861_v21 = vpop.xlane.xlu0 %860  ;;  %46 = vst.msk [vmem:[#allocation3 + $0x30] sm:$0xff] %vm39_vm3, %v1690_v5  ;;  %47 = vst.msk [vmem:[#allocation3 + $0x38] sm:$0xff] %vm39_vm3, %v1690_v5  ;;  %1543 = vpow2.f32 %v175_v6  ;;  %v2028_v6 = vld [vmem:[%s2243_s3] sm:$0xff] }
 0x126   :  { %v1925_v26 = vmax.f32 %v1912_v18, %v861_v21  ;;  %48 = vst.msk [vmem:[#allocation3 + $0x40] sm:$0xff] %vm39_vm3, %v1690_v5  ;;  %49 = vst.msk [vmem:[#allocation3 + $0x48] sm:$0xff] %vm39_vm3, %v1690_v5  ;;  %v667_v9 = vmul.f32 1.442695, %v663_v1  ;;  %v2014_v21 = vld [vmem:[%s2242_s2 + $0x78] sm:$0xff] }
 0x127   :  { %50 = vst.msk [vmem:[#allocation3 + $0x50] sm:$0xff] %vm39_vm3, %v1690_v5  ;;  %51 = vst.msk [vmem:[#allocation3 + $0x58] sm:$0xff] %vm39_vm3, %v1690_v5  ;;  %1494 = vmatprep.subr.mxu1 %v2014_v21 }
 0x128   :  { %391 = vperm.xlu1 %1532, %v1890_v8   ;;  %1062 = vst.msk [vmem:[#allocation2 + $0x60] sm:$0xff] %vm22_vm5, %v1925_v26  ;;  %1545 = vpow2.f32 %v667_v9  ;;  %v911_v44 = vsub.f32 %v1912_v18, %v1925_v26 }
 0x129   :  { %v864_v35 = vpop.xlane.xlu1 %863  ;;  %v619_v36 = vpop.xlane.xlu0 %618  ;;  %52 = vst.msk [vmem:[#allocation3 + $0x60] sm:$0xff] %vm39_vm3, %v1690_v5  ;;  %53 = vst.msk [vmem:[#allocation3 + $0x68] sm:$0xff] %vm39_vm3, %v1690_v5  ;;  %1547 = vpow2.f32 %v421_v13 }
 0x12a   :  { %v1942_v41 = vmax.f32 %v1927_v27, %v864_v35  ;;  %v625_v43 = vmax.f32 %v1929_v28, %v619_v36  ;;  %54 = vst.msk [vmem:[#allocation3 + $0x70] sm:$0xff] %vm39_vm3, %v1690_v5  ;;  %55 = vst.msk [vmem:[#allocation3 + $0x78] sm:$0xff] %vm39_vm3, %v1690_v5 }
 0x12c   :  { %1063 = vst.msk [vmem:[#allocation2 + $0x68] sm:$0xff] %vm22_vm5, %v1942_v41  ;;  %396 = vperm.xlu1 %1532, %v1879_v2   ;;  %882 = vperm.xlu0 %1531, %v1942_v41   ;;  %816 = vst.msk [vmem:[#allocation2 + $0x50] sm:$0xff] %vm22_vm5, %v625_v43  ;;  %v665_v10 = vsub.f32 %v1929_v28, %v625_v43  ;;  %v915_v2 = vmul.f32 1.442695, %v911_v44  ;;  %v170_v28 = vsub.f32 %v1851_v52, %v1857_v57 }
 0x12d   :  { %v867_v42 = vpop.xlane.xlu0 %866  ;;  %v912_v34 = vsub.f32 %v1927_v27, %v1942_v41 }
 0x12e   :  { %v622_v55 = vpop.xlane.xlu1 %621  ;;  %v1962_v60 = vmax.f32 %v1948_v47, %v867_v42  ;;  %v671_v49 = vmul.f32 1.442695, %v665_v10  ;;  %v177_v38 = vmul.f32 1.442695, %v170_v28  ;;  %v57_v10 = vunpack.c.0.s8 %v2028_v6 }
 0x12f   :  { %v1965_v63 = vmax.f32 %v1957_v40, %v622_v55  ;;  %v917_v45 = vmul.f32 1.442695, %v912_v34 }
 0x130   :  { %629 = vperm.xlu1 %1532, %v1910_v15   ;;  %1064 = vst.msk [vmem:[#allocation2 + $0x70] sm:$0xff] %vm22_vm5, %v1962_v60  ;;  %v1536_v15 = vpop.eup %1535  ;;  %1549 = vpow2.f32 %v671_v49  ;;  %v913_v18 = vsub.f32 %v1948_v47, %v1962_v60  ;;  %v2033_v14 = vcvt.s32.f32 %v57_v10 }
 0x131   :  { %817 = vst.msk [vmem:[#allocation2 + $0x58] sm:$0xff] %vm22_vm5, %v1965_v63  ;;  %644 = vperm.xlu0 %1531, %v1965_v63   ;;  %v1538_v22 = vpop.eup %1537  ;;  %1551 = vpow2.f32 %v425_v20  ;;  %v666_v12 = vsub.f32 %v1957_v40, %v1965_v63 }
 0x132   :  { %1553 = vpow2.f32 %v915_v2  ;;  %v919_v29 = vmul.f32 1.442695, %v913_v18 }
 0x133   :  { %v870_v8 = vpop.xlane.xlu1 %869  ;;  %1555 = vpow2.f32 %v669_v4  ;;  %v673_v35 = vmul.f32 1.442695, %v666_v12 }
 0x134   :  { %v874_v11 = vmax.f32 %v858_v58, %v870_v8  ;;  %877 = vperm.xlu1 %1532, %v1925_v26   ;;  %v1540_v26 = vpop.eup %1539  ;;  %1557 = vpow2.f32 %v919_v29 }
 0x135   :  { %v1542_v30 = vpop.eup %1541  ;;  %1559 = vpow2.f32 %v673_v35  ;;  %v59_v35 = vunpack.c.2.s8 %v2028_v6 }
 0x136   :  { %1065 = vst.msk [vmem:[#allocation2 + $0x78] sm:$0xff] %vm22_vm5, %v874_v11  ;;  %892 = vperm.xlu0 %1531, %v874_v11   ;;  %v1544_v36 = vpop.eup %1543  ;;  %v914_v47 = vsub.f32 %v858_v58, %v874_v11  ;;  %1561 = vpow2.f32 %v177_v38 }
 0x137   :  { %1563 = vpow2.f32 %v917_v45 }
 0x138   :  { %639 = vperm.xlu1 %1532, %v625_v43   ;;  %v1546_v43 = vpop.eup %1545  ;;  %v921_v48 = vmul.f32 1.442695, %v914_v47 }
 0x139   :  { %v1548_v52 = vpop.eup %1547 }
 0x13a   :  { %190 = vperm.xlu0 %1531, %v1536_v15   ;;  %1565 = vpow2.f32 %v921_v48 }
 0x13c   :  { %887 = vperm.xlu1 %1532, %v1962_v60  }
 0x13d   :  { %v1550_v57 = vpop.eup %1549 }
 0x13e   :  { %434 = vperm.xlu0 %1531, %v1538_v22   ;;  %v1552_v51 = vpop.eup %1551 }
 0x13f   :  { %v1554_v27 = vpop.eup %1553 }
 0x140   :  { %185 = vperm.xlu1 %1532, %v1540_v26   ;;  %v1556_v41 = vpop.eup %1555 }
 0x141   :  { %v1558_v40 = vpop.eup %1557 }
 0x142   :  { %444 = vperm.xlu0 %1531, %v1542_v30   ;;  %v1560_v42 = vpop.eup %1559 }
 0x143   :  { %v1562_v53 = vpop.eup %1561 }
 0x144   :  { %195 = vperm.xlu1 %1532, %v1544_v36   ;;  %v1564_v54 = vpop.eup %1563 }
 0x146   :  { %682 = vperm.xlu0 %1531, %v1546_v43  }
 0x147   :  { %v1566_v55 = vpop.eup %1565 }
 0x148   :  { %439 = vperm.xlu1 %1532, %v1548_v52  }
 0x14a   :  { %692 = vperm.xlu0 %1531, %v1550_v57   ;;  %v2061_v57 = vcvt.s32.f32 %v59_v35 }
 0x14c   :  { %449 = vperm.xlu1 %1532, %v1552_v51  }
 0x14e   :  { %930 = vperm.xlu0 %1531, %v1554_v27  }
 0x150   :  { %687 = vperm.xlu1 %1532, %v1556_v41  }
 0x152   :  { %940 = vperm.xlu0 %1531, %v1558_v40  }
 0x154   :  { %697 = vperm.xlu1 %1532, %v1560_v42  }
 0x156   :  { %200 = vperm.xlu0 %1531, %v1562_v53   ;;  %v1397_v53 = vld [vmem:[%s2242_s2 + $0x68] sm:$0xff] }
 0x158   :  { %935 = vperm.xlu1 %1532, %v1564_v54  }
 0x15c   :  { %945 = vperm.xlu1 %1532, %v1566_v55  }
 0x18b   :  { %v134_v60 = vpop.permute.xlu0 %133 }
 0x18c   :  { %v151_v63 = vsub.f32 %v1745_v24, %v134_v60 }
 0x18e   :  { %v155_v0 = vmul.f32 1.442695, %v151_v63 }
 0x18f   :  { %v139_v1 = vpop.permute.xlu1 %138 }
 0x190   :  { %1567 = vpow2.f32 %v155_v0  ;;  %v152_v5 = vsub.f32 %v1749_v32, %v139_v1  ;;  %v58_v32 = vunpack.c.1.s8 %v2028_v6  ;;  %v1396_v0 = vld [vmem:[%s2242_s2 + $0x60] sm:$0xff] }
 0x192   :  { %v157_v58 = vmul.f32 1.442695, %v152_v5  ;;  %v2038_v61 = vcvt.s32.f32 %v58_v32 }
 0x193   :  { %v382_v62 = vpop.permute.xlu1 %381 }
 0x194   :  { %1569 = vpow2.f32 %v157_v58  ;;  %v399_v8 = vsub.f32 %v1774_v39, %v382_v62 }
 0x196   :  { %v403_v9 = vmul.f32 1.442695, %v399_v8 }
 0x197   :  { %v387_v11 = vpop.permute.xlu1 %386 }
 0x198   :  { %1571 = vpow2.f32 %v403_v9  ;;  %v400_v24 = vsub.f32 %v1751_v33, %v387_v11 }
 0x19a   :  { %v405_v13 = vmul.f32 1.442695, %v400_v24 }
 0x19b   :  { %v144_v44 = vpop.permute.xlu1 %143 }
 0x19c   :  { %1573 = vpow2.f32 %v405_v13  ;;  %v153_v49 = vsub.f32 %v1784_v50, %v144_v44  ;;  %v1390_v50 = vld [vmem:[%s2242_s2 + $0x50] sm:$0xff] }
 0x19d   :  { %v1568_v15 = vpop.eup %1567  ;;  %v635_v12 = vpop.permute.xlu0 %634 }
 0x19e   :  { %v159_v20 = vmul.f32 1.442695, %v153_v49  ;;  %v163_v39 = vmul.f32 %v1568_v15, %v2033_v14  ;;  %v648_v36 = vsub.f32 %v1798_v3, %v635_v12  ;;  %v60_v3 = vunpack.c.3.s8 %v2028_v6 }
 0x19f   :  { %v149_v2 = vpop.permute.xlu1 %148 }
 0x1a0   :  { %1575 = vpow2.f32 %v159_v20  ;;  %v154_v18 = vsub.f32 %v1779_v46, %v149_v2  ;;  %1460 = vmatprep.mubr.msk.f32.mxu0 %vm114_vm1, %v163_v39  ;;  %v1389_v46 = vld [vmem:[%s2242_s2 + $0x48] sm:$0xff]  ;;  %v653_v48 = vmul.f32 1.442695, %v648_v36  ;;  %v64_v55 = vcvt.s32.f32 %v60_v3 }
 0x1a1   :  { %v1570_v33 = vpop.eup %1569 }
 0x1a2   :  { %v161_v22 = vmul.f32 1.442695, %v154_v18  ;;  %v164_v4 = vmul.f32 %v1570_v33, %v2038_v61 }
 0x1a3   :  { %v392_v26 = vpop.permute.xlu1 %391 }
 0x1a4   :  { %1577 = vpow2.f32 %v161_v22  ;;  %v401_v28 = vsub.f32 %v1789_v56, %v392_v26  ;;  %1461 = vmatmul.mubr.msk.f32.vlgmr.msra.gmra.mxu0 %vm114_vm1, %v164_v4  ;;  %v1388_v56 = vld [vmem:[%s2242_s2 + $0x40] sm:$0xff] }
 0x1a5   :  { %v1572_v29 = vpop.eup %1571  ;;  %1481 = vmatpush3.msra.mxu0 %v2003_v19 }
 0x1a6   :  { %v407_v30 = vmul.f32 1.442695, %v401_v28  ;;  %v411_v34 = vmul.f32 %v1572_v29, %v2033_v14  ;;  %1482 = vmatprep.subr.mxu0 %v1390_v50 }
 0x1a7   :  { %v397_v38 = vpop.permute.xlu1 %396  ;;  %v883_v43 = vpop.permute.xlu0 %882  ;;  %1483 = vmatpush3.msra.mxu0 %v1390_v50 }
 0x1a8   :  { %1579 = vpow2.f32 %v407_v30  ;;  %v402_v19 = vsub.f32 %v1791_v59, %v397_v38  ;;  %1474 = vmatprep.mubr.msk.f32.mxu1 %vm114_vm1, %v411_v34  ;;  %1484 = vmatprep.subr.mxu0 %v1389_v46  ;;  %v896_v51 = vsub.f32 %v1814_v23, %v883_v43  ;;  %v1398_v59 = vld [vmem:[%s2242_s2 + $0x70] sm:$0xff]  ;;  %v180_v43 = vld [vmem:[#allocation3 + $0x8] sm:$0xff]  ;;  %s1692_s2 = smov 8  }
 0x1a9   :  { %v1574_v45 = vpop.eup %1573  ;;  %1485 = vmatpush3.msra.mxu0 %v1389_v46 }
 0x1aa   :  { %v409_v47 = vmul.f32 1.442695, %v402_v19  ;;  %v412_v52 = vmul.f32 %v1574_v45, %v2038_v61  ;;  %1486 = vmatprep.subr.mxu0 %v1388_v56  ;;  %v901_v60 = vmul.f32 1.442695, %v896_v51 }
 0x1ab   :  { %v630_v27 = vpop.permute.xlu1 %629  ;;  %1487 = vmatpush3.msra.mxu0 %v1388_v56  ;;  %v179_v56 = vld [vmem:[#allocation3] sm:$0xff] }
 0x1ac   :  { %1581 = vpow2.f32 %v409_v47  ;;  %v647_v41 = vsub.f32 %v1802_v7, %v630_v27  ;;  %1475 = vmatmul.mubr.msk.f32.vlgmr.msra.gmra.mxu1 %vm114_vm1, %v412_v52  ;;  %v645_v40 = vpop.permute.xlu0 %644  ;;  %v429_v27 = vld [vmem:[#allocation3 + $0x28] sm:$0xff] }
 0x1ad   :  { %v1576_v42 = vpop.eup %1575  ;;  %1495 = vmatpush3.msra.mxu1 %v2014_v21  ;;  %1583 = vpow2.f32 %v653_v48  ;;  %v650_v63 = vsub.f32 %v1822_v31, %v645_v40 }
 0x1ae   :  { %v651_v23 = vmul.f32 1.442695, %v647_v41  ;;  %v165_v54 = vmul.f32 %v1576_v42, %v2061_v57  ;;  %1496 = vmatprep.subr.mxu1 %v1398_v59  ;;  %v428_v41 = vld [vmem:[#allocation3 + $0x20] sm:$0xff] }
 0x1af   :  { %v878_v7 = vpop.permute.xlu1 %877  ;;  %1497 = vmatpush3.msra.mxu1 %v1398_v59  ;;  %v657_v31 = vmul.f32 1.442695, %v650_v63 }
 0x1b0   :  { %1585 = vpow2.f32 %v651_v23  ;;  %v895_v21 = vsub.f32 %v1806_v16, %v878_v7  ;;  %1463 = vmatprep.mubr.msk.f32.mxu0 %vm114_vm1, %v165_v54  ;;  %1498 = vmatprep.subr.mxu1 %v1397_v53 }
 0x1b1   :  { %v1578_v1 = vpop.eup %1577  ;;  %v893_v5 = vpop.permute.xlu0 %892  ;;  %1499 = vmatpush3.msra.mxu1 %v1397_v53  ;;  %1587 = vpow2.f32 %v901_v60 }
 0x1b2   :  { %v899_v58 = vmul.f32 1.442695, %v895_v21  ;;  %v166_v62 = vmul.f32 %v1578_v1, %v64_v55  ;;  %1500 = vmatprep.subr.mxu1 %v1396_v0  ;;  %v898_v6 = vsub.f32 %v1826_v37, %v893_v5  ;;  %v181_v1 = vld [vmem:[#allocation3 + $0x10] sm:$0xff] }
 0x1b3   :  { %v640_v8 = vpop.permute.xlu1 %639  ;;  %1501 = vmatpush3.msra.mxu1 %v1396_v0  ;;  %v182_v0 = vld [vmem:[#allocation3 + $0x18] sm:$0xff] }
 0x1b4   :  { %1589 = vpow2.f32 %v899_v58  ;;  %v649_v9 = vsub.f32 %v1808_v17, %v640_v8  ;;  %1464 = vmatmul.mubr.msk.f32.gmra.mxu0 %vm114_vm1, %v166_v62  ;;  %v905_v24 = vmul.f32 1.442695, %v898_v6 }
 0x1b5   :  { %v1580_v16 = vpop.eup %1579  ;;  %1591 = vpow2.f32 %v657_v31  ;;  %v191_v46 = vpop.permute.xlu0 %190 }
 0x1b6   :  { %v655_v10 = vmul.f32 1.442695, %v649_v9  ;;  %v413_v11 = vmul.f32 %v1580_v16, %v2061_v57  ;;  %v204_v45 = vmul.f32 %v191_v46, %v180_v43  ;;  %v678_v43 = vld [vmem:[#allocation3 + $0x50] sm:$0xff] }
 0x1b7   :  { %v888_v13 = vpop.permute.xlu1 %887 }
 0x1b8   :  { %1593 = vpow2.f32 %v655_v10  ;;  %v897_v32 = vsub.f32 %v1816_v25, %v888_v13  ;;  %1477 = vmatprep.mubr.msk.f32.mxu1 %vm114_vm1, %v413_v11  ;;  %v431_v10 = vld [vmem:[#allocation3 + $0x38] sm:$0xff] }
 0x1b9   :  { %v1582_v37 = vpop.eup %1581  ;;  %1595 = vpow2.f32 %v905_v24  ;;  %v435_v30 = vpop.permute.xlu0 %434  ;;  %v430_v24 = vld [vmem:[#allocation3 + $0x30] sm:$0xff] }
 0x1ba   :  { %v903_v44 = vmul.f32 1.442695, %v897_v32  ;;  %v414_v49 = vmul.f32 %v1582_v37, %v64_v55  ;;  %v1584_v15 = vpop.eup %1583  ;;  %v452_v23 = vmul.f32 %v435_v30, %v428_v41 }
 0x1bb   :  { %v660_v39 = vmul.f32 %v1584_v15, %v2038_v61  ;;  %v186_v36 = vpop.permute.xlu1 %185  ;;  %v677_v15 = vld [vmem:[#allocation3 + $0x48] sm:$0xff] }
 0x1bc   :  { %1597 = vpow2.f32 %v903_v44  ;;  %1478 = vmatmul.mubr.msk.f32.gmra.mxu1 %vm114_vm1, %v414_v49 }
 0x1bd   :  { %v1586_v17 = vpop.eup %1585  ;;  %v445_v34 = vpop.permute.xlu0 %444 }
 0x1be   :  { %v659_v20 = vmul.f32 %v1586_v17, %v2033_v14  ;;  %v1588_v2 = vpop.eup %1587  ;;  %v454_v49 = vmul.f32 %v445_v34, %v430_v24 }
 0x1bf   :  { %v908_v33 = vmul.f32 %v1588_v2, %v2038_v61  ;;  %v1691_v61 = vmov 8   ;;  %v196_v19 = vpop.permute.xlu1 %195  ;;  %v676_v2 = vld [vmem:[#allocation3 + $0x40] sm:$0xff] }
 0x1c0   :  { %1488 = vmatprep.mubr.msk.f32.mxu0 %vm114_vm1, %v659_v20  ;;  %1533 = vset.pattern.permute.xlu0 %v1691_v61  ;;  %v205_v62 = vmul.f32 %v196_v19, %v181_v1 }
 0x1c1   :  { %v1590_v18 = vpop.eup %1589  ;;  %1489 = vmatmul.mubr.msk.f32.vlgmr.msra.gmra.mxu0 %vm114_vm1, %v660_v39  ;;  %1534 = vset.pattern.permute.xlu1 %v1691_v61  ;;  %v2102_v35 = vpop.permute.xlu0 %682  ;;  %v679_v61 = vld [vmem:[#allocation3 + $0x58] sm:$0xff] }
 0x1c2   :  { %v907_v25 = vmul.f32 %v1590_v18, %v2033_v14  ;;  %v1592_v22 = vpop.eup %1591 }
 0x1c3   :  { %v662_v26 = vmul.f32 %v1592_v22, %v64_v55  ;;  %v440_v59 = vpop.permute.xlu1 %439 }
 0x1c4   :  { %1502 = vmatprep.mubr.msk.f32.mxu1 %vm114_vm1, %v907_v25  ;;  %v453_v42 = vmul.f32 %v440_v59, %v429_v27  ;;  %v926_v27 = vld [vmem:[#allocation3 + $0x70] sm:$0xff] }
 0x1c5   :  { %v1594_v4 = vpop.eup %1593  ;;  %1503 = vmatmul.mubr.msk.f32.vlgmr.msra.gmra.mxu1 %vm114_vm1, %v908_v33  ;;  %v2104_v38 = vpop.permute.xlu0 %692  ;;  %v925_v33 = vld [vmem:[#allocation3 + $0x68] sm:$0xff] }
 0x1c6   :  { %v661_v12 = vmul.f32 %v1594_v4, %v2061_v57  ;;  %v1596_v50 = vpop.eup %1595 }
 0x1c7   :  { %v910_v14 = vmul.f32 %v1596_v50, %v64_v55  ;;  %v450_v63 = vpop.permute.xlu1 %449  ;;  %v924_v50 = vld [vmem:[#allocation3 + $0x60] sm:$0xff] }
 0x1c8   :  { %1491 = vmatprep.mubr.msk.f32.mxu0 %vm114_vm1, %v661_v12  ;;  %v455_v32 = vmul.f32 %v450_v63, %v431_v10  ;;  %v700_v12 = vmul.f32 %v2102_v35, %v676_v2 }
 0x1c9   :  { %v1598_v28 = vpop.eup %1597  ;;  %1492 = vmatmul.mubr.msk.f32.gmra.mxu0 %vm114_vm1, %v662_v26  ;;  %v2106_v47 = vpop.permute.xlu0 %930 }
 0x1ca   :  { %v909_v29 = vmul.f32 %v1598_v28, %v2061_v57  ;;  %v203_v57 = vmul.f32 %v186_v36, %v179_v56  ;;  %v948_v30 = vmul.f32 %v2106_v47, %v924_v50  ;;  %v702_v47 = vmul.f32 %v2104_v38, %v678_v43 }
 0x1cb   :  { %v688_v31 = vpop.permute.xlu1 %687 }
 0x1cc   :  { %1505 = vmatprep.mubr.msk.f32.mxu1 %vm114_vm1, %v909_v29  ;;  %v701_v25 = vmul.f32 %v688_v31, %v677_v15 }
 0x1cd   :  { %1506 = vmatmul.mubr.msk.f32.gmra.mxu1 %vm114_vm1, %v910_v14  ;;  %v2110_v40 = vpop.permute.xlu0 %940 }
 0x1cf   :  { %v698_v37 = vpop.permute.xlu1 %697 }
 0x1d0   :  { %v703_v35 = vmul.f32 %v698_v37, %v679_v61 }
 0x1d1   :  { %v201_v21 = vpop.permute.xlu0 %200 }
 0x1d2   :  { %v206_v5 = vmul.f32 %v201_v21, %v182_v0 }
 0x1d3   :  { %v936_v22 = vpop.permute.xlu1 %935 }
 0x1d4   :  { %v949_v29 = vmul.f32 %v936_v22, %v925_v33 }
 0x264   :  { %v1462_v52 = vpop.f32.mrf.mxu0 }
 0x265   :  { %v309_v3 = vadd.f32 %v1462_v52, %v204_v45  ;;  %v927_v52 = vld [vmem:[#allocation3 + $0x78] sm:$0xff] }
 0x266   :  { %v289_v48 = vpop.f32.mrf.mxu0 }
 0x267   :  { %314 = vst.msk [vmem:[#allocation3 + $0x8] sm:$0xff] %vm39_vm3, %v309_v3  ;;  %v308_v51 = vadd.f32 %v289_v48, %v203_v57  ;;  %v946_v57 = vpop.permute.xlu1 %945 }
 0x268   :  { %v951_v41 = vmul.f32 %v946_v57, %v927_v52 }
 0x269   :  { %313 = vst.msk [vmem:[#allocation3] sm:$0xff] %vm39_vm3, %v308_v51 }
 0x26c   :  { %v1476_v53 = vpop.f32.mrf.mxu1 }
 0x26d   :  { %v559_v54 = vadd.f32 %v1476_v53, %v453_v42 }
 0x26e   :  { %v539_v55 = vpop.f32.mrf.mxu1  ;;  %v2112_v60 = vld [vmem:[#allocation3 + $0x8] sm:$0xff] }
 0x26f   :  { %563 = vst.msk [vmem:[#allocation3 + $0x28] sm:$0xff] %vm39_vm3, %v559_v54  ;;  %v558_v7 = vadd.f32 %v539_v55, %v452_v23  ;;  %1080 = vperm.xlu0 %1533, %v2112_v60   ;;  %v950_v54 = vmul.f32 %v2110_v40, %v926_v27 }
 0x270   :  { %v2125_v13 = vld [vmem:[#allocation3] sm:$0xff] }
 0x271   :  { %562 = vst.msk [vmem:[#allocation3 + $0x20] sm:$0xff] %vm39_vm3, %v558_v7 }
 0x274   :  { %v1465_v58 = vpop.f32.mrf.mxu0 }
 0x275   :  { %v311_v6 = vadd.f32 %v1465_v58, %v206_v5 }
 0x276   :  { %v299_v8 = vpop.f32.mrf.mxu0  ;;  %v2117_v9 = vld [vmem:[#allocation3 + $0x28] sm:$0xff] }
 0x277   :  { %316 = vst.msk [vmem:[#allocation3 + $0x18] sm:$0xff] %vm39_vm3, %v311_v6  ;;  %v310_v16 = vadd.f32 %v299_v8, %v205_v62  ;;  %1136 = vperm.xlu1 %1534, %v2117_v9  }
 0x278   :  { %v2121_v11 = vld [vmem:[#allocation3 + $0x20] sm:$0xff] }
 0x279   :  { %315 = vst.msk [vmem:[#allocation3 + $0x10] sm:$0xff] %vm39_vm3, %v310_v16  ;;  %1131 = vperm.xlu0 %1533, %v2121_v11  }
 0x27b   :  { %1075 = vperm.xlu1 %1534, %v2125_v13  }
 0x27c   :  { %v1479_v44 = vpop.f32.mrf.mxu1 }
 0x27d   :  { %v561_v17 = vadd.f32 %v1479_v44, %v455_v32 }
 0x27e   :  { %v549_v20 = vpop.f32.mrf.mxu1  ;;  %v2128_v39 = vld [vmem:[#allocation3 + $0x18] sm:$0xff] }
 0x27f   :  { %565 = vst.msk [vmem:[#allocation3 + $0x38] sm:$0xff] %vm39_vm3, %v561_v17  ;;  %v560_v18 = vadd.f32 %v549_v20, %v454_v49  ;;  %1090 = vperm.xlu1 %1534, %v2128_v39  }
 0x280   :  { %v2146_v51 = vld [vmem:[#allocation3 + $0x10] sm:$0xff] }
 0x281   :  { %564 = vst.msk [vmem:[#allocation3 + $0x30] sm:$0xff] %vm39_vm3, %v560_v18  ;;  %v1490_v4 = vpop.f32.mrf.mxu0 }
 0x282   :  { %v807_v26 = vadd.f32 %v1490_v4, %v701_v25 }
 0x283   :  { %v787_v28 = vpop.f32.mrf.mxu0 }
 0x284   :  { %811 = vst.msk [vmem:[#allocation3 + $0x48] sm:$0xff] %vm39_vm3, %v807_v26  ;;  %v806_v14 = vadd.f32 %v787_v28, %v700_v12 }
 0x285   :  { %v1504_v46 = vpop.f32.mrf.mxu1 }
 0x286   :  { %810 = vst.msk [vmem:[#allocation3 + $0x40] sm:$0xff] %vm39_vm3, %v806_v14  ;;  %v1055_v34 = vadd.f32 %v1504_v46, %v949_v29  ;;  %v2137_v36 = vld [vmem:[#allocation3 + $0x38] sm:$0xff] }
 0x287   :  { %v1035_v56 = vpop.f32.mrf.mxu1  ;;  %1146 = vperm.xlu1 %1534, %v2137_v36  }
 0x288   :  { %1059 = vst.msk [vmem:[#allocation3 + $0x68] sm:$0xff] %vm39_vm3, %v1055_v34  ;;  %v1054_v19 = vadd.f32 %v1035_v56, %v948_v30  ;;  %v2141_v45 = vld [vmem:[#allocation3 + $0x30] sm:$0xff] }
 0x289   :  { %v1493_v3 = vpop.f32.mrf.mxu0  ;;  %1141 = vperm.xlu0 %1533, %v2141_v45  }
 0x28a   :  { %1058 = vst.msk [vmem:[#allocation3 + $0x60] sm:$0xff] %vm39_vm3, %v1054_v19  ;;  %v809_v48 = vadd.f32 %v1493_v3, %v703_v35 }
 0x28b   :  { %v797_v59 = vpop.f32.mrf.mxu0  ;;  %1085 = vperm.xlu1 %1534, %v2146_v51   ;;  %v2155_v55 = vld [vmem:[#allocation3 + $0x48] sm:$0xff] }
 0x28c   :  { %813 = vst.msk [vmem:[#allocation3 + $0x58] sm:$0xff] %vm39_vm3, %v809_v48  ;;  %v808_v42 = vadd.f32 %v797_v59, %v702_v47 }
 0x28d   :  { %v1507_v53 = vpop.f32.mrf.mxu1  ;;  %v2150_v23 = vld [vmem:[#allocation3 + $0x40] sm:$0xff] }
 0x28e   :  { %812 = vst.msk [vmem:[#allocation3 + $0x50] sm:$0xff] %vm39_vm3, %v808_v42  ;;  %v1057_v38 = vadd.f32 %v1507_v53, %v951_v41  ;;  %1187 = vperm.xlu0 %1533, %v2150_v23  }
 0x28f   :  { %v1045_v63 = vpop.f32.mrf.mxu1  ;;  %1192 = vperm.xlu1 %1534, %v2155_v55   ;;  %v2163_v40 = vld [vmem:[#allocation3 + $0x68] sm:$0xff] }
 0x290   :  { %1061 = vst.msk [vmem:[#allocation3 + $0x78] sm:$0xff] %vm39_vm3, %v1057_v38  ;;  %v1056_v7 = vadd.f32 %v1045_v63, %v950_v54 }
 0x291   :  { %v2159_v0 = vld [vmem:[#allocation3 + $0x60] sm:$0xff] }
 0x292   :  { %1060 = vst.msk [vmem:[#allocation3 + $0x70] sm:$0xff] %vm39_vm3, %v1056_v7  ;;  %1243 = vperm.xlu0 %1533, %v2159_v0   ;;  %vm1346_vm3 = vcmask 130048  }
 0x293   :  { %1248 = vperm.xlu1 %1534, %v2163_v40   ;;  %v2169_v1 = vld [vmem:[#allocation3 + $0x58] sm:$0xff] }
 0x295   :  { %v2166_v21 = vld [vmem:[#allocation3 + $0x50] sm:$0xff] }
 0x296   :  { %1197 = vperm.xlu0 %1533, %v2166_v21  }
 0x297   :  { %1202 = vperm.xlu1 %1534, %v2169_v1   ;;  %v2175_v58 = vld [vmem:[#allocation3 + $0x78] sm:$0xff] }
 0x299   :  { %v2172_v5 = vld [vmem:[#allocation3 + $0x70] sm:$0xff] }
 0x29a   :  { %1253 = vperm.xlu0 %1533, %v2172_v5  }
 0x29b   :  { %1258 = vperm.xlu1 %1534, %v2175_v58  }
 0x2ea   :  { %v2178_v62 = vpop.permute.xlu0 %1080 }
 0x2f2   :  { %v1137_v31 = vpop.permute.xlu1 %1136 }
 0x2f3   :  { %1599 = vrcp.f32 %v1137_v31 }
 0x2f4   :  { %v1132_v6 = vpop.permute.xlu0 %1131 }
 0x2f5   :  { %1601 = vrcp.f32 %v1132_v6 }
 0x2f6   :  { %v2180_v8 = vpop.permute.xlu1 %1075 }
 0x2fa   :  { %v2182_v16 = vpop.permute.xlu1 %1090 }
 0x300   :  { %v1600_v10 = vpop.eup %1599 }
 0x301   :  { %v1152_v24 = vmul.f32 %v1600_v10, %v2117_v9 }
 0x302   :  { %v1602_v32 = vpop.eup %1601  ;;  %v1147_v37 = vpop.permute.xlu1 %1146 }
 0x303   :  { %1603 = vrcp.f32 %v1147_v37  ;;  %v1162_v44 = vmin.f32 %v1152_v24, 0.0  ;;  %v1150_v49 = vmul.f32 %v1602_v32, %v2121_v11  ;;  %vm1158_vm4 = vcmp.gt.f32.partialorder %v1152_v24, 0.0 }
 0x304   :  { %v1142_v15 = vpop.permute.xlu0 %1141 }
 0x305   :  { %1605 = vrcp.f32 %v1142_v15  ;;  %v1167_v17 = vmul.f32 1.442695, %v1162_v44  ;;  %v1161_v20 = vmin.f32 %v1150_v49, 0.0  ;;  %vm1157_vm5 = vcmp.gt.f32.partialorder %v1150_v49, 0.0 }
 0x306   :  { %v2186_v2 = vpop.permute.xlu1 %1085 }
 0x307   :  { %v1165_v18 = vmul.f32 1.442695, %v1161_v20  ;;  %1607 = vpow2.f32 %v1167_v17 }
 0x309   :  { %v1188_v25 = vpop.permute.xlu0 %1187  ;;  %1609 = vpow2.f32 %v1165_v18 }
 0x30a   :  { %1611 = vrcp.f32 %v1188_v25  ;;  %v1193_v33 = vpop.permute.xlu1 %1192 }
 0x30b   :  { %1613 = vrcp.f32 %v1193_v33 }
 0x30d   :  { %v1244_v9 = vpop.permute.xlu0 %1243 }
 0x30e   :  { %1615 = vrcp.f32 %v1244_v9  ;;  %v1249_v22 = vpop.permute.xlu1 %1248 }
 0x30f   :  { %1617 = vrcp.f32 %v1249_v22 }
 0x310   :  { %v1604_v4 = vpop.eup %1603 }
 0x311   :  { %v1198_v12 = vpop.permute.xlu0 %1197  ;;  %v2189_v11 = vmul.f32 %v1604_v4, %v2137_v36 }
 0x312   :  { %v1606_v26 = vpop.eup %1605  ;;  %1619 = vrcp.f32 %v1198_v12  ;;  %v1203_v50 = vpop.permute.xlu1 %1202 }
 0x313   :  { %1621 = vrcp.f32 %v1203_v50  ;;  %v1164_v28 = vmin.f32 %v2189_v11, 0.0  ;;  %v2193_v29 = vmul.f32 %v1606_v26, %v2141_v45  ;;  %vm1160_vm6 = vcmp.gt.f32.partialorder %v2189_v11, 0.0 }
 0x314   :  { %v1608_v14 = vpop.eup %1607 }
 0x315   :  { %v1254_v61 = vpop.permute.xlu0 %1253  ;;  %v1171_v46 = vmul.f32 1.442695, %v1164_v28  ;;  %v1163_v30 = vmin.f32 %v2193_v29, 0.0  ;;  %v1409_v56 = vadd.f32 -1.0, %v1608_v14  ;;  %vm1159_vm7 = vcmp.gt.f32.partialorder %v2193_v29, 0.0 }
 0x316   :  { %v1610_v34 = vpop.eup %1609  ;;  %1623 = vrcp.f32 %v1254_v61  ;;  %v1259_v43 = vpop.permute.xlu1 %1258 }
 0x317   :  { %v1612_v36 = vpop.eup %1611  ;;  %1625 = vrcp.f32 %v1259_v43  ;;  %v1408_v35 = vadd.f32 -1.0, %v1610_v34  ;;  %v1169_v19 = vmul.f32 1.442695, %v1163_v30  ;;  %v1178_v57 = vsel %vm1158_vm4, %v1152_v24, %v1409_v56 }
 0x318   :  { %v1614_v52 = vpop.eup %1613  ;;  %1627 = vpow2.f32 %v1171_v46  ;;  %v1206_v45 = vmul.f32 %v1612_v36, %v2150_v23  ;;  %1299 = vrot.lane.b32.xlu1 %v1178_v57, %s1692_s2 }
 0x319   :  { %v1177_v3 = vsel %vm1157_vm5, %v1150_v49, %v1408_v35  ;;  %1629 = vpow2.f32 %v1169_v19  ;;  %v1208_v47 = vmul.f32 %v1614_v52, %v2155_v55  ;;  %vm1351_vm5 = vcmask 195584  }
 0x31a   :  { %1297 = vrot.lane.b32.xlu0 %v1177_v3, %s1692_s2  ;;  %v1217_v48 = vmin.f32 %v1206_v45, 0.0  ;;  %vm1213_vm8 = vcmp.gt.f32.partialorder %v1206_v45, 0.0 }
 0x31b   :  { %v1616_v27 = vpop.eup %1615  ;;  %v1218_v59 = vmin.f32 %v1208_v47, 0.0  ;;  %vm1214_vm9 = vcmp.gt.f32.partialorder %v1208_v47, 0.0 }
 0x31c   :  { %v1618_v41 = vpop.eup %1617  ;;  %v1221_v42 = vmul.f32 1.442695, %v1217_v48  ;;  %v1262_v53 = vmul.f32 %v1616_v27, %v2159_v0 }
 0x31d   :  { %v1223_v54 = vmul.f32 1.442695, %v1218_v59  ;;  %v1264_v38 = vmul.f32 %v1618_v41, %v2163_v40 }
 0x31e   :  { %1631 = vpow2.f32 %v1221_v42  ;;  %v1273_v23 = vmin.f32 %v1262_v53, 0.0  ;;  %vm1269_vm10 = vcmp.gt.f32.partialorder %v1262_v53, 0.0 }
 0x31f   :  { %v1620_v63 = vpop.eup %1619  ;;  %1633 = vpow2.f32 %v1223_v54  ;;  %v1274_v7 = vmin.f32 %v1264_v38, 0.0  ;;  %vm1270_vm11 = vcmp.gt.f32.partialorder %v1264_v38, 0.0 }
 0x320   :  { %v1622_v31 = vpop.eup %1621  ;;  %v1277_v6 = vmul.f32 1.442695, %v1273_v23  ;;  %v1210_v55 = vmul.f32 %v1620_v63, %v2166_v21 }
 0x321   :  { %v1279_v10 = vmul.f32 1.442695, %v1274_v7  ;;  %v1212_v24 = vmul.f32 %v1622_v31, %v2169_v1 }
 0x322   :  { %1635 = vpow2.f32 %v1277_v6  ;;  %v1219_v32 = vmin.f32 %v1210_v55, 0.0  ;;  %vm1215_vm12 = vcmp.gt.f32.partialorder %v1210_v55, 0.0 }
 0x323   :  { %v1624_v37 = vpop.eup %1623  ;;  %1637 = vpow2.f32 %v1279_v10  ;;  %v1220_v0 = vmin.f32 %v1212_v24, 0.0  ;;  %vm1216_vm13 = vcmp.gt.f32.partialorder %v1212_v24, 0.0 }
 0x324   :  { %v1626_v44 = vpop.eup %1625  ;;  %v1225_v49 = vmul.f32 1.442695, %v1219_v32  ;;  %v1266_v40 = vmul.f32 %v1624_v37, %v2172_v5 }
 0x325   :  { %v1628_v15 = vpop.eup %1627  ;;  %v1227_v17 = vmul.f32 1.442695, %v1220_v0  ;;  %v1268_v20 = vmul.f32 %v1626_v44, %v2175_v58 }
 0x326   :  { %v1630_v18 = vpop.eup %1629  ;;  %v1411_v25 = vadd.f32 -1.0, %v1628_v15  ;;  %1639 = vpow2.f32 %v1225_v49  ;;  %v1275_v21 = vmin.f32 %v1266_v40, 0.0  ;;  %vm1271_vm14 = vcmp.gt.f32.partialorder %v1266_v40, 0.0 }
 0x327   :  { %v1410_v1 = vadd.f32 -1.0, %v1630_v18  ;;  %1641 = vpow2.f32 %v1227_v17  ;;  %v1276_v33 = vmin.f32 %v1268_v20, 0.0  ;;  %vm1272_vm15 = vcmp.gt.f32.partialorder %v1268_v20, 0.0 }
 0x328   :  { %v1180_v9 = vsel %vm1160_vm6, %v2189_v11, %v1411_v25  ;;  %v1281_v22 = vmul.f32 1.442695, %v1275_v21 }
 0x329   :  { %1303 = vrot.lane.b32.xlu1 %v1180_v9, %s1692_s2  ;;  %v1179_v5 = vsel %vm1159_vm7, %v2193_v29, %v1410_v1  ;;  %v1283_v4 = vmul.f32 1.442695, %v1276_v33 }
 0x32a   :  { %1301 = vrot.lane.b32.xlu0 %v1179_v5, %s1692_s2  ;;  %1643 = vpow2.f32 %v1281_v22 }
 0x32b   :  { %v1632_v58 = vpop.eup %1631  ;;  %1645 = vpow2.f32 %v1283_v4 }
 0x32c   :  { %v1634_v12 = vpop.eup %1633  ;;  %v1412_v26 = vadd.f32 -1.0, %v1632_v58  ;;  %1647 = vrcp.f32 %v2180_v8 }
 0x32d   :  { %v1413_v50 = vadd.f32 -1.0, %v1634_v12  ;;  %1649 = vrcp.f32 %v2178_v62 }
 0x32e   :  { %v1233_v28 = vsel %vm1213_vm8, %v1206_v45, %v1412_v26  ;;  %1651 = vrcp.f32 %v2186_v2 }
 0x32f   :  { %v1636_v11 = vpop.eup %1635  ;;  %1313 = vrot.lane.b32.xlu0 %v1233_v28, %s1693_s28  ;;  %v1234_v14 = vsel %vm1214_vm9, %v1208_v47, %v1413_v50  ;;  %1653 = vrcp.f32 %v2182_v16 }
 0x330   :  { %v1638_v61 = vpop.eup %1637  ;;  %1315 = vrot.lane.b32.xlu1 %v1234_v14, %s1693_s28  ;;  %v1416_v46 = vadd.f32 -1.0, %v1636_v11 }
 0x331   :  { %v1417_v29 = vadd.f32 -1.0, %v1638_v61 }
 0x332   :  { %v1289_v30 = vsel %vm1269_vm10, %v1262_v53, %v1416_v46 }
 0x333   :  { %v1640_v34 = vpop.eup %1639  ;;  %1329 = vrot.lane.b32.xlu0 %v1289_v30, %s1694_s29  ;;  %v1290_v43 = vsel %vm1270_vm11, %v1264_v38, %v1417_v29 }
 0x334   :  { %v1642_v56 = vpop.eup %1641  ;;  %1331 = vrot.lane.b32.xlu1 %v1290_v43, %s1694_s29  ;;  %v1414_v36 = vadd.f32 -1.0, %v1640_v34 }
 0x335   :  { %v1415_v35 = vadd.f32 -1.0, %v1642_v56 }
 0x336   :  { %v1235_v19 = vsel %vm1215_vm12, %v1210_v55, %v1414_v36 }
 0x337   :  { %v1644_v52 = vpop.eup %1643  ;;  %1317 = vrot.lane.b32.xlu0 %v1235_v19, %s1693_s28  ;;  %v1236_v57 = vsel %vm1216_vm13, %v1212_v24, %v1415_v35 }
 0x338   :  { %v1646_v45 = vpop.eup %1645  ;;  %1319 = vrot.lane.b32.xlu1 %v1236_v57, %s1693_s28  ;;  %v1418_v3 = vadd.f32 -1.0, %v1644_v52 }
 0x339   :  { %v1419_v47 = vadd.f32 -1.0, %v1646_v45  ;;  %v1648_v59 = vpop.eup %1647 }
 0x33a   :  { %v1291_v48 = vsel %vm1271_vm14, %v1266_v40, %v1418_v3  ;;  %v1650_v41 = vpop.eup %1649  ;;  %v1094_v42 = vmul.f32 %v1648_v59, %v2125_v13 }
 0x33b   :  { %1333 = vrot.lane.b32.xlu0 %v1291_v48, %s1694_s29  ;;  %v1292_v27 = vsel %vm1272_vm15, %v1268_v20, %v1419_v47  ;;  %v1096_v53 = vmul.f32 %v1650_v41, %v2112_v60  ;;  %v1652_v38 = vpop.eup %1651 }
 0x33c   :  { %1335 = vrot.lane.b32.xlu1 %v1292_v27, %s1694_s29  ;;  %v1105_v54 = vmin.f32 %v1094_v42, 0.0  ;;  %v1654_v63 = vpop.eup %1653  ;;  %v1098_v31 = vmul.f32 %v1652_v38, %v2146_v51  ;;  %vm1101_vm2 = vcmp.gt.f32.partialorder %v1094_v42, 0.0 }
 0x33d   :  { %v1106_v23 = vmin.f32 %v1096_v53, 0.0  ;;  %v1100_v62 = vmul.f32 %v1654_v63, %v2128_v39  ;;  %vm1102_vm4 = vcmp.gt.f32.partialorder %v1096_v53, 0.0 }
 0x33e   :  { %v1109_v7 = vmul.f32 1.442695, %v1105_v54  ;;  %v1107_v2 = vmin.f32 %v1098_v31, 0.0  ;;  %vm1103_vm6 = vcmp.gt.f32.partialorder %v1098_v31, 0.0 }
 0x33f   :  { %v1111_v8 = vmul.f32 1.442695, %v1106_v23  ;;  %v1108_v16 = vmin.f32 %v1100_v62, 0.0  ;;  %vm1104_vm7 = vcmp.gt.f32.partialorder %v1100_v62, 0.0 }
 0x340   :  { %1655 = vpow2.f32 %v1109_v7  ;;  %v1113_v6 = vmul.f32 1.442695, %v1107_v2 }
 0x341   :  { %1657 = vpow2.f32 %v1111_v8  ;;  %v1115_v55 = vmul.f32 1.442695, %v1108_v16 }
 0x342   :  { %1659 = vpow2.f32 %v1113_v6 }
 0x343   :  { %1661 = vpow2.f32 %v1115_v55 }
 0x34d   :  { %v1656_v10 = vpop.eup %1655 }
 0x34e   :  { %v1658_v32 = vpop.eup %1657  ;;  %v1404_v0 = vadd.f32 -1.0, %v1656_v10 }
 0x34f   :  { %v1405_v44 = vadd.f32 -1.0, %v1658_v32  ;;  %v1660_v40 = vpop.eup %1659 }
 0x350   :  { %v1121_v49 = vsel %vm1101_vm2, %v1094_v42, %v1404_v0  ;;  %v1662_v20 = vpop.eup %1661  ;;  %v1406_v22 = vadd.f32 -1.0, %v1660_v40 }
 0x351   :  { %v1122_v15 = vsel %vm1102_vm4, %v1096_v53, %v1405_v44  ;;  %v1407_v4 = vadd.f32 -1.0, %v1662_v20 }
 0x352   :  { %v1123_v26 = vsel %vm1103_vm6, %v1098_v31, %v1406_v22 }
 0x353   :  { %v1124_v50 = vsel %vm1104_vm7, %v1100_v62, %v1407_v4 }
 0x38a   :  { %v1300_v60 = vpop.permute.xlu1 %1299 }
 0x38b   :  { %v1343_v18 = vsel %vm1341_vm0, %v1122_v15, %v1300_v60 }
 0x38c   :  { %v1298_v13 = vpop.permute.xlu0 %1297 }
 0x38d   :  { %v1342_v17 = vsel %vm1341_vm0, %v1121_v49, %v1298_v13 }
 0x39b   :  { %v1304_v37 = vpop.permute.xlu1 %1303 }
 0x39c   :  { %v1302_v24 = vpop.permute.xlu0 %1301  ;;  %v1345_v11 = vsel %vm1341_vm0, %v1124_v50, %v1304_v37 }
 0x39d   :  { %v1344_v28 = vsel %vm1341_vm0, %v1123_v26, %v1302_v24 }
 0x3a1   :  { %v1314_v51 = vpop.permute.xlu0 %1313 }
 0x3a2   :  { %v1316_v39 = vpop.permute.xlu1 %1315  ;;  %v1347_v25 = vsel %vm1346_vm3, %v1342_v17, %v1314_v51 }
 0x3a3   :  { %v1348_v1 = vsel %vm1346_vm3, %v1343_v18, %v1316_v39 }
 0x3a5   :  { %v1330_v21 = vpop.permute.xlu0 %1329 }
 0x3a6   :  { %v1352_v33 = vsel %vm1351_vm5, %v1347_v25, %v1330_v21  ;;  %v1332_v9 = vpop.permute.xlu1 %1331 }
 0x3a7   :  { %1356 = vst.msk [vmem:[#allocation4] sm:$0xff] %vm114_vm1, %v1352_v33  ;;  %v1353_v5 = vsel %vm1351_vm5, %v1348_v1, %v1332_v9 }
 0x3a8   :  { %1357 = vst.msk [vmem:[#allocation4 + $0x8] sm:$0xff] %vm114_vm1, %v1353_v5 }
 0x3a9   :  { %v1318_v58 = vpop.permute.xlu0 %1317 }
 0x3aa   :  { %v1320_v12 = vpop.permute.xlu1 %1319  ;;  %v1349_v14 = vsel %vm1346_vm3, %v1344_v28, %v1318_v58 }
 0x3ab   :  { %v1350_v46 = vsel %vm1346_vm3, %v1345_v11, %v1320_v12 }
 0x3ad   :  { %v1334_v61 = vpop.permute.xlu0 %1333 }
 0x3ae   :  { %v1354_v29 = vsel %vm1351_vm5, %v1349_v14, %v1334_v61  ;;  %v1336_v30 = vpop.permute.xlu1 %1335 }
 0x3af   :  { %1358 = vst.msk [vmem:[#allocation4 + $0x10] sm:$0xff] %vm114_vm1, %v1354_v29  ;;  %v1355_v34 = vsel %vm1351_vm5, %v1350_v46, %v1336_v30 }
 0x3b0   :  { %1359 = vst.msk [vmem:[#allocation4 + $0x18] sm:$0xff] %vm114_vm1, %v1355_v34 }
 0x3b1   :  { %1674 = shalt.err (!%p1671_p4)
}
 0x3b2   :  { %s1696_s7 = smov 128  }
 0x3b3   :  { %1371 = dma.vmem_to_hbm [thread:$0]  %s1366_s5, 512, %s2244_s4, [#allocation5], %s1696_s7, %s1696_s7, %s1692_s2  }
 0x3b4   :  { %1683 = dma.done.wait [#allocation5], 512  }
 0x3b5   :  { %1684 = vsyncadd [#allocation5], 4294966784 }
 0x3b6   :  { %1375 = vsyncpa [#allocation5], 1 }

</bundles_post_ra>
